<compile_context>
chip_gen: v7x
topology: tpu7x:2x2x1
jax: 0.10.0
libtpu: 0.0.40
codegen_flags: <defaults>
</compile_context>

<pallas_src>
import functools
import math

import jax
import jax.numpy as jnp
from jax import lax
from jax.experimental import pallas as pl
from jax.experimental.pallas import tpu as pltpu


# ----------------------------------------------------------------------------
# Kernel 1: hubert_encoder (conv k3 [BN folded] -> GELU -> conv k3), per batch
# ----------------------------------------------------------------------------
def _hubert_encoder_kernel(mel_ref, w1_ref, b1_ref, w2_ref, o_ref):
    x = mel_ref[...]                                    # (T, 1024) bf16
    t = x.shape[0]
    cout = o_ref.shape[-1]

    ridx = lax.broadcasted_iota(jnp.int32, (t, cout), 0)
    first = ridx == 0
    last = ridx == t - 1

    def conv_combine(prod):
        # prod columns: [tap0 | tap1 | tap2] products, each `cout` wide.
        p0 = prod[:, 0 * cout:1 * cout]
        p1 = prod[:, 1 * cout:2 * cout]
        p2 = prod[:, 2 * cout:3 * cout]
        # value from t-1 / t+1 via XLU sublane rotation + boundary zero mask
        down = pltpu.roll(p0, shift=1, axis=0)
        up = pltpu.roll(p2, shift=t - 1, axis=0)
        down = jnp.where(first, 0.0, down)
        up = jnp.where(last, 0.0, up)
        return down + p1 + up

    # conv1 (BN folded into w1/b1): single stacked bf16 matmul, f32 accumulate
    h = conv_combine(jnp.dot(x, w1_ref[...], preferred_element_type=jnp.float32))
    h = h + b1_ref[...]
    h = jax.nn.gelu(h, approximate=True)
    y = conv_combine(jnp.dot(h.astype(jnp.bfloat16), w2_ref[...],
                             preferred_element_type=jnp.float32))
    o_ref[...] = y.astype(o_ref.dtype)


def hubert_encoder(mel_flat, w1s, b1, w2s, *, batch, seq):
    cin = mel_flat.shape[1]
    cout = b1.shape[-1]
    return pl.pallas_call(
        _hubert_encoder_kernel,
        out_shape=jax.ShapeDtypeStruct((batch * seq, cout), jnp.bfloat16),
        grid_spec=pltpu.PrefetchScalarGridSpec(
            num_scalar_prefetch=0,
            grid=(batch,),
            in_specs=[
                pl.BlockSpec((seq, cin), lambda b: (b, 0)),
                pl.BlockSpec(w1s.shape, lambda b: (0, 0)),
                pl.BlockSpec(b1.shape, lambda b: (0, 0)),
                pl.BlockSpec(w2s.shape, lambda b: (0, 0)),
            ],
            out_specs=pl.BlockSpec((seq, cout), lambda b: (b, 0)),
        ),
        compiler_params=pltpu.CompilerParams(
            dimension_semantics=("parallel",),
            vmem_limit_bytes=48 * 1024 * 1024),
    )(mel_flat, w1s, b1, w2s)


# ----------------------------------------------------------------------------
# Kernel 2: in-context transformer backbone
#   grid = (batch [parallel], depth [arbitrary]); hidden state resident in VMEM
# ----------------------------------------------------------------------------
def _layer_norm(x, g, b, eps=1e-5):
    mu = jnp.mean(x, axis=-1, keepdims=True)
    var = jnp.mean(jnp.square(x - mu), axis=-1, keepdims=True)
    return (x - mu) * lax.rsqrt(var + eps) * g + b


def _icl_transformer_kernel(
    a_ref, bias_ref, wa_ref, bin_ref, vec_ref, qkvf1_ref, of2_ref,
    lnfg_ref, lnfb_ref, wout_ref, bout_ref,
    o_ref, h_ref, attn_ref, *, heads, dim_head):

    layer = pl.program_id(1)
    bf16, f32 = jnp.bfloat16, jnp.float32

    seq, dim = h_ref.shape
    inner = heads * dim_head
    scale = 1.0 / math.sqrt(dim_head)

    @pl.when(layer == 0)
    def _():
        # zero_input_for_transformer=True -> x projection is identically zero;
        # only the audio projection feeds the initial hidden state.
        h_ref[...] = (jnp.dot(a_ref[...], wa_ref[...],
                              preferred_element_type=f32) + bin_ref[...])

    h = h_ref[...]                                     # (T, dim) f32
    bias = bias_ref[0]                                 # (1, T) additive key mask

    # --- unpack per-layer packed params (static, 128-aligned column offsets) ---
    vec = vec_ref[0]                                   # (1, 6*dim + ff) f32
    ln1_g = vec[:, 0 * dim:1 * dim]
    ln1_b = vec[:, 1 * dim:2 * dim]
    b_o = vec[:, 2 * dim:3 * dim]
    ln2_g = vec[:, 3 * dim:4 * dim]
    ln2_b = vec[:, 4 * dim:5 * dim]
    b_f2 = vec[:, 5 * dim:6 * dim]
    b_f1 = vec[:, 6 * dim:vec.shape[1]]
    qkvf1_cols = qkvf1_ref.shape[2]
    w_qkv = qkvf1_ref[0, :, 0:3 * inner]               # (dim, 3*inner) bf16
    w_f1 = qkvf1_ref[0, :, 3 * inner:qkvf1_cols]       # (dim, ff)      bf16
    of2_rows = of2_ref.shape[1]
    w_o = of2_ref[0, 0:inner, :]                       # (inner, dim)   bf16
    w_f2 = of2_ref[0, inner:of2_rows, :]               # (ff, dim)      bf16

    # --- self attention (pre-LN) ---
    hn = _layer_norm(h, ln1_g, ln1_b).astype(bf16)
    qkv = jnp.dot(hn, w_qkv, preferred_element_type=f32)    # (T, 3*inner) f32
    for hd in range(heads):
        q = qkv[:, hd * dim_head:(hd + 1) * dim_head].astype(bf16)
        k = qkv[:, inner + hd * dim_head:inner + (hd + 1) * dim_head].astype(bf16)
        v = qkv[:, 2 * inner + hd * dim_head:
                2 * inner + (hd + 1) * dim_head].astype(bf16)
        s = lax.dot_general(q, k, (((1,), (1,)), ((), ())),
                            preferred_element_type=f32) * scale + bias
        s = s - jnp.max(s, axis=-1, keepdims=True)
        e = jnp.exp(s)
        p = e * pl.reciprocal(jnp.sum(e, axis=-1, keepdims=True), approx=True)
        # write this head's output into the (T, inner) slab (no concatenate)
        attn_ref[:, hd * dim_head:(hd + 1) * dim_head] = jnp.dot(
            p.astype(bf16), v, preferred_element_type=f32)
    # single K = inner output projection (MXU-filled, one weight load)
    attn_proj = jnp.dot(attn_ref[...].astype(bf16), w_o,
                        preferred_element_type=f32)
    h = h + attn_proj + b_o

    # --- feed-forward (pre-LN) ---
    hn2 = _layer_norm(h, ln2_g, ln2_b).astype(bf16)
    ff = jnp.dot(hn2, w_f1, preferred_element_type=f32) + b_f1
    ff = jax.nn.gelu(ff, approximate=True).astype(bf16)
    h = h + jnp.dot(ff, w_f2, preferred_element_type=f32) + b_f2
    h_ref[...] = h

    @pl.when(layer == pl.num_programs(1) - 1)
    def _():
        hf = _layer_norm(h, lnfg_ref[...], lnfb_ref[...]).astype(bf16)
        # lane-dense (128-wide, zero-padded) output store
        o_ref[...] = (jnp.dot(hf, wout_ref[...], preferred_element_type=f32)
                      + bout_ref[...])


def icl_transformer(audio2_flat, attn_bias, p, *, batch, seq, heads=8, dim_head=64):
    depth = p['vecs'].shape[0]
    dim = p['b_in'].shape[-1]
    out_pad = p['w_out_p'].shape[1]
    inner = heads * dim_head

    def const_spec(arr):
        nd = arr.ndim
        return pl.BlockSpec(arr.shape, lambda b, l, nd=nd: (0,) * nd)

    def per_layer_spec(arr):
        return pl.BlockSpec((1,) + arr.shape[1:], lambda b, l: (l, 0, 0))

    in_specs = [
        pl.BlockSpec((seq, audio2_flat.shape[-1]), lambda b, l: (b, 0)),
        pl.BlockSpec((1, 1, seq), lambda b, l: (b, 0, 0)),
        const_spec(p['w_in_a']), const_spec(p['b_in']),
        per_layer_spec(p['vecs']), per_layer_spec(p['qkvf1']),
        per_layer_spec(p['of2']),
        const_spec(p['lnf_g']), const_spec(p['lnf_b']),
        const_spec(p['w_out_p']), const_spec(p['b_out_p']),
    ]

    kernel = functools.partial(_icl_transformer_kernel,
                               heads=heads, dim_head=dim_head)
    return pl.pallas_call(
        kernel,
        out_shape=jax.ShapeDtypeStruct((batch * seq, out_pad), jnp.float32),
        grid_spec=pltpu.PrefetchScalarGridSpec(
            num_scalar_prefetch=0,
            grid=(batch, depth),
            in_specs=in_specs,
            out_specs=pl.BlockSpec((seq, out_pad), lambda b, l: (b, 0)),
            scratch_shapes=[pltpu.VMEM((seq, dim), jnp.float32),
                            pltpu.VMEM((seq, inner), jnp.float32)],
        ),
        compiler_params=pltpu.CompilerParams(
            dimension_semantics=("parallel", "arbitrary"),
            vmem_limit_bytes=48 * 1024 * 1024),
    )(audio2_flat, attn_bias, p['w_in_a'], p['b_in'], p['vecs'],
      p['qkvf1'], p['of2'], p['lnf_g'], p['lnf_b'], p['w_out_p'], p['b_out_p'])


# ----------------------------------------------------------------------------
# Full forward (inference path of InContextAudio2MotionModel)
# ----------------------------------------------------------------------------
def icl_audio2motion_forward(pp, mel, y_mask):
    B, T_mel, Cin = mel.shape
    T_y = y_mask.shape[1]
    assert T_mel == 2 * T_y, "hubert audio frames must be 2x motion frames"
    assert T_mel % 8 == 0 and T_y % 8 == 0

    mel_flat = mel.astype(jnp.bfloat16).reshape(B * T_mel, Cin)
    cond_flat = hubert_encoder(mel_flat, pp['hub_w1s'], pp['hub_b1'],
                               pp['hub_w2s'], batch=B, seq=T_mel)  # (B*T_mel,256) bf16
    # audio at 2x motion frame rate: fold adjacent frame pairs into channels.
    audio2 = cond_flat.reshape(B * T_y, 2 * cond_flat.shape[-1])   # (B*T_y, 512) bf16

    mask_f = y_mask.astype(jnp.float32)
    attn_bias = jnp.where(mask_f > 0.0, 0.0, -1e9)[:, None, :]     # (B, 1, T_y)

    out_pad = icl_transformer(audio2, attn_bias, pp, batch=B, seq=T_y)
    x_recon = out_pad[:, :64].reshape(B, T_y, 64)
    return x_recon * mask_f[..., None]                  # x_recon * mask.unsqueeze(-1)


# ----------------------------------------------------------------------------
# Parameter preparation: BN folding, tap stacking, bf16 cast, slab packing
# ----------------------------------------------------------------------------
def prepare_params(p):
    f32, bf16 = jnp.float32, jnp.bfloat16
    pp = {}
    # fold eval-mode BatchNorm1d into conv1:
    #   y = (conv(x) - m) * g / sqrt(v+eps) + b  ==  conv(x, w*s) + (b - m*s)
    s = p['bn_g'] * lax.rsqrt(p['bn_v'] + 1e-5)                  # (1, 256)
    w1 = p['hub_w1'] * s                                         # (3, 1024, 256)
    pp['hub_w1s'] = jnp.concatenate([w1[0], w1[1], w1[2]], axis=1).astype(bf16)
    pp['hub_b1'] = (p['bn_b'] - p['bn_m'] * s).astype(f32)
    pp['hub_w2s'] = jnp.concatenate(
        [p['hub_w2'][0], p['hub_w2'][1], p['hub_w2'][2]], axis=1).astype(bf16)

    pp['w_in_a'] = p['w_in_a'].astype(bf16)
    pp['b_in'] = p['b_in'].astype(f32)
    # packed per-layer vectors: [ln1_g|ln1_b|b_o|ln2_g|ln2_b|b_f2|b_f1]
    pp['vecs'] = jnp.concatenate(
        [p['ln1_g'], p['ln1_b'], p['b_o'], p['ln2_g'], p['ln2_b'],
         p['b_f2'], p['b_f1']], axis=-1).astype(f32)             # (D,1,2560)
    # packed per-layer matmul weights (bf16)
    pp['qkvf1'] = jnp.concatenate([p['w_qkv'], p['w_f1']], axis=-1).astype(bf16)
    pp['of2'] = jnp.concatenate([p['w_o'], p['w_f2']], axis=1).astype(bf16)
    pp['lnf_g'] = p['lnf_g'].astype(f32)
    pp['lnf_b'] = p['lnf_b'].astype(f32)
    # pad final projection to a lane-dense 128-wide output
    pad = 128 - p['w_out'].shape[1]
    pp['w_out_p'] = jnp.pad(p['w_out'], ((0, 0), (0, pad))).astype(bf16)
    pp['b_out_p'] = jnp.pad(p['b_out'], ((0, 0), (0, pad))).astype(f32)
    return pp


# ----------------------------------------------------------------------------
# Pure-JAX reference (same math / same bf16 cast points / same prepared params)
# ----------------------------------------------------------------------------
def reference_forward(pp, mel, y_mask, heads=8, dim_head=64):
    f32, bf16 = jnp.float32, jnp.bfloat16
    B, T_mel, Cin = mel.shape
    T_y = y_mask.shape[1]
    dim = pp['b_in'].shape[-1]
    Cout = pp['hub_b1'].shape[-1]
    inner = heads * dim_head
    scale = 1.0 / math.sqrt(dim_head)

    def conv(x_bf, ws):                               # x (B,T,Cin) bf16
        prod = jnp.dot(x_bf, ws, preferred_element_type=f32)
        p0 = prod[..., :Cout]
        p1 = prod[..., Cout:2 * Cout]
        p2 = prod[..., 2 * Cout:]
        z = jnp.zeros((B, 1, Cout), f32)
        return (jnp.concatenate([z, p0[:, :-1]], axis=1) + p1
                + jnp.concatenate([p2[:, 1:], z], axis=1))

    h = conv(mel.astype(bf16), pp['hub_w1s']) + pp['hub_b1']
    h = jax.nn.gelu(h, approximate=True)
    cond = conv(h.astype(bf16), pp['hub_w2s']).astype(bf16)      # (B, T_mel, 256)
    audio2 = cond.reshape(B, T_y, 2 * Cout)

    mask_f = y_mask.astype(f32)
    attn_bias = jnp.where(mask_f[:, None, :] > 0.0, 0.0, -1e9)

    def ln(v, g, b, eps=1e-5):
        mu = jnp.mean(v, axis=-1, keepdims=True)
        var = jnp.mean(jnp.square(v - mu), axis=-1, keepdims=True)
        return (v - mu) * lax.rsqrt(var + eps) * g + b

    hidden = jnp.dot(audio2, pp['w_in_a'], preferred_element_type=f32) + pp['b_in']
    depth = pp['vecs'].shape[0]
    for l in range(depth):
        vec = pp['vecs'][l, 0]
        ln1_g, ln1_b = vec[:dim], vec[dim:2 * dim]
        b_o = vec[2 * dim:3 * dim]
        ln2_g, ln2_b = vec[3 * dim:4 * dim], vec[4 * dim:5 * dim]
        b_f2 = vec[5 * dim:6 * dim]
        b_f1 = vec[6 * dim:]
        w_qkv = pp['qkvf1'][l][:, :3 * inner]
        w_f1 = pp['qkvf1'][l][:, 3 * inner:]
        w_o = pp['of2'][l][:inner]
        w_f2 = pp['of2'][l][inner:]

        hn = ln(hidden, ln1_g, ln1_b).astype(bf16)
        qkv = jnp.einsum('btd,de->bte', hn, w_qkv, preferred_element_type=f32)
        outs = []
        for hd in range(heads):
            q = qkv[..., hd * dim_head:(hd + 1) * dim_head].astype(bf16)
            k = qkv[..., inner + hd * dim_head:inner + (hd + 1) * dim_head].astype(bf16)
            v = qkv[..., 2 * inner + hd * dim_head:
                    2 * inner + (hd + 1) * dim_head].astype(bf16)
            s = jnp.einsum('btd,bsd->bts', q, k,
                           preferred_element_type=f32) * scale + attn_bias
            pr = jax.nn.softmax(s, axis=-1)
            outs.append(jnp.einsum('bts,bsd->btd', pr.astype(bf16), v,
                                   preferred_element_type=f32))
        attn = jnp.concatenate(outs, axis=-1).astype(bf16)
        hidden = hidden + jnp.einsum('bti,id->btd', attn, w_o,
                                     preferred_element_type=f32) + b_o
        hn2 = ln(hidden, ln2_g, ln2_b).astype(bf16)
        ff = jnp.einsum('btd,df->btf', hn2, w_f1, preferred_element_type=f32) + b_f1
        ff = jax.nn.gelu(ff, approximate=True).astype(bf16)
        hidden = hidden + jnp.einsum('btf,fd->btd', ff, w_f2,
                                     preferred_element_type=f32) + b_f2
    hf = ln(hidden, pp['lnf_g'][0], pp['lnf_b'][0]).astype(bf16)
    out = jnp.einsum('btd,de->bte', hf, pp['w_out_p'],
                     preferred_element_type=f32) + pp['b_out_p']
    return out[..., :64] * mask_f[..., None]


# ----------------------------------------------------------------------------
# Deterministic parameter init (shapes dictated by the module's __init__)
# ----------------------------------------------------------------------------
def init_params(key, depth=16, dim=256, heads=8, dim_head=64, ff_mult=4,
                dim_in=64, hubert_dim=1024):
    inner = heads * dim_head
    ff = ff_mult * dim
    ks = iter(jax.random.split(key, 8))
    n = lambda k, s, sc=0.02: sc * jax.random.normal(k, s, jnp.float32)
    p = {}
    # hubert_encoder: Conv1d weights stored as (tap, C_in, C_out)
    p['hub_w1'] = n(next(ks), (3, hubert_dim, dim))
    p['hub_w2'] = n(next(ks), (3, dim, dim))
    p['bn_g'] = jnp.ones((1, dim), jnp.float32)
    p['bn_b'] = jnp.zeros((1, dim), jnp.float32)
    p['bn_m'] = jnp.zeros((1, dim), jnp.float32)
    p['bn_v'] = jnp.ones((1, dim), jnp.float32)
    # backbone (zero_input_for_transformer=True -> no x-projection weight needed)
    p['w_in_a'] = n(next(ks), (2 * dim, dim))
    p['b_in'] = jnp.zeros((1, dim), jnp.float32)
    p['ln1_g'] = jnp.ones((depth, 1, dim), jnp.float32)
    p['ln1_b'] = jnp.zeros((depth, 1, dim), jnp.float32)
    p['w_qkv'] = n(next(ks), (depth, dim, 3 * inner))
    p['w_o'] = n(next(ks), (depth, inner, dim))
    p['b_o'] = jnp.zeros((depth, 1, dim), jnp.float32)
    p['ln2_g'] = jnp.ones((depth, 1, dim), jnp.float32)
    p['ln2_b'] = jnp.zeros((depth, 1, dim), jnp.float32)
    p['w_f1'] = n(next(ks), (depth, dim, ff))
    p['b_f1'] = jnp.zeros((depth, 1, ff), jnp.float32)
    p['w_f2'] = n(next(ks), (depth, ff, dim))
    p['b_f2'] = jnp.zeros((depth, 1, dim), jnp.float32)
    p['lnf_g'] = jnp.ones((1, dim), jnp.float32)
    p['lnf_b'] = jnp.zeros((1, dim), jnp.float32)
    p['w_out'] = n(next(ks), (dim, dim_in))
    p['b_out'] = jnp.zeros((1, dim_in), jnp.float32)
    return p


if __name__ == "__main__":
    key = jax.random.PRNGKey(0)
    k_param, k_mel = jax.random.split(key)

    B, T_y = 2, 8
    T_mel = 2 * T_y                                    # hubert frames = 2x motion frames
    base = init_params(k_param)
    params = prepare_params(base)

    mel = jax.random.normal(k_mel, (B, T_mel, 1024), jnp.float32)  # batch['audio']
    y_mask = jnp.ones((B, T_y), jnp.bool_).at[1, 6:].set(False)    # batch['y_mask']

    out = jax.block_until_ready(icl_audio2motion_forward(params, mel, y_mask))

    ref = reference_forward(params, mel, y_mask)
    assert out.shape == (B, T_y, 64)
    assert bool(jnp.allclose(out, ref, rtol=1e-2, atol=1e-2)), "mismatch vs reference"
    print("KERNEL_OK")
</pallas_src>

<mosaic_0001>
module attributes {stable_mosaic.version = 11 : i64} {
  func.func @_hubert_encoder_kernel(%arg0: i32, %arg1: memref<16x1024xbf16, #tpu.memory_space<vmem>>, %arg2: memref<1024x768xbf16, #tpu.memory_space<vmem>>, %arg3: memref<1x256xf32, #tpu.memory_space<vmem>>, %arg4: memref<256x768xbf16, #tpu.memory_space<vmem>>, %arg5: memref<16x256xbf16, #tpu.memory_space<vmem>>) attributes {dimension_semantics = [#tpu.dimension_semantics<parallel>], iteration_bounds = array<i64: 2>, scalar_prefetch = 0 : i64, scratch_operands = 0 : i64, tpu.core_type = #tpu.core_type<tc>, window_params = [{transform_indices = @transform_0, window_bounds = array<i64: 16, 1024>}, {pipeline_mode = #tpu.pipeline_mode<synchronous>, transform_indices = @transform_1, window_bounds = array<i64: 1024, 768>}, {pipeline_mode = #tpu.pipeline_mode<synchronous>, transform_indices = @transform_2, window_bounds = array<i64: 1, 256>}, {pipeline_mode = #tpu.pipeline_mode<synchronous>, transform_indices = @transform_3, window_bounds = array<i64: 256, 768>}, {transform_indices = @transform_4, window_bounds = array<i64: 16, 256>}]} {
    %c0 = arith.constant 0 : index
    %c0_0 = arith.constant 0 : index
    %0 = vector.load %arg1[%c0, %c0_0] : memref<16x1024xbf16, #tpu.memory_space<vmem>>, vector<16x1024xbf16>
    %1 = tpu.iota {dimensions = array<i32: 0>} : vector<16x256xi32>
    %c0_i32 = arith.constant 0 : i32
    %2 = vector.broadcast %c0_i32 : i32 to vector<16x256xi32>
    %3 = arith.cmpi eq, %1, %2 : vector<16x256xi32>
    %c15_i32 = arith.constant 15 : i32
    %4 = vector.broadcast %c15_i32 : i32 to vector<16x256xi32>
    %5 = arith.cmpi eq, %1, %4 : vector<16x256xi32>
    %c0_1 = arith.constant 0 : index
    %c0_2 = arith.constant 0 : index
    %6 = vector.load %arg2[%c0_1, %c0_2] : memref<1024x768xbf16, #tpu.memory_space<vmem>>, vector<1024x768xbf16>
    %cst = arith.constant dense<0.000000e+00> : vector<16x768xf32>
    %7 = tpu.matmul %0, %6, %cst {dimension_numbers = #tpu.dot_dimension_numbers<[1], [0], [0], [1], [0, 0, 1, 1], [], []>} : vector<16x1024xbf16>, vector<1024x768xbf16>, vector<16x768xf32> -> vector<16x768xf32>
    %8 = vector.extract_strided_slice %7 {offsets = [0, 0], sizes = [16, 256], strides = [1, 1]} : vector<16x768xf32> to vector<16x256xf32>
    %9 = vector.extract_strided_slice %7 {offsets = [0, 256], sizes = [16, 256], strides = [1, 1]} : vector<16x768xf32> to vector<16x256xf32>
    %10 = vector.extract_strided_slice %7 {offsets = [0, 512], sizes = [16, 256], strides = [1, 1]} : vector<16x768xf32> to vector<16x256xf32>
    %c1_i32 = arith.constant 1 : i32
    %11 = tpu.dynamic_rotate %8 by %c1_i32 dim 0 : vector<16x256xf32>, i32 -> vector<16x256xf32>
    %c15_i32_3 = arith.constant 15 : i32
    %12 = tpu.dynamic_rotate %10 by %c15_i32_3 dim 0 : vector<16x256xf32>, i32 -> vector<16x256xf32>
    %cst_4 = arith.constant 0.000000e+00 : f32
    %13 = vector.broadcast %cst_4 : f32 to vector<16x256xf32>
    %14 = arith.select %3, %13, %11 : vector<16x256xi1>, vector<16x256xf32>
    %cst_5 = arith.constant 0.000000e+00 : f32
    %15 = vector.broadcast %cst_5 : f32 to vector<16x256xf32>
    %16 = arith.select %5, %15, %12 : vector<16x256xi1>, vector<16x256xf32>
    %17 = arith.addf %14, %9 : vector<16x256xf32>
    %18 = arith.addf %17, %16 : vector<16x256xf32>
    %c0_6 = arith.constant 0 : index
    %c0_7 = arith.constant 0 : index
    %19 = vector.load %arg3[%c0_6, %c0_7] : memref<1x256xf32, #tpu.memory_space<vmem>>, vector<1x256xf32>
    %20 = vector.broadcast %19 : vector<1x256xf32> to vector<16x256xf32>
    %21 = arith.addf %18, %20 : vector<16x256xf32>
    %22 = arith.mulf %21, %21 : vector<16x256xf32>
    %23 = arith.mulf %21, %22 : vector<16x256xf32>
    %cst_8 = arith.constant 4.471500e-02 : f32
    %24 = vector.broadcast %cst_8 : f32 to vector<16x256xf32>
    %25 = arith.mulf %24, %23 : vector<16x256xf32>
    %26 = arith.addf %21, %25 : vector<16x256xf32>
    %cst_9 = arith.constant 0.797884583 : f32
    %27 = vector.broadcast %cst_9 : f32 to vector<16x256xf32>
    %28 = arith.mulf %27, %26 : vector<16x256xf32>
    %29 = math.tanh %28 : vector<16x256xf32>
    %cst_10 = arith.constant 1.000000e+00 : f32
    %30 = vector.broadcast %cst_10 : f32 to vector<16x256xf32>
    %31 = arith.addf %30, %29 : vector<16x256xf32>
    %cst_11 = arith.constant 5.000000e-01 : f32
    %32 = vector.broadcast %cst_11 : f32 to vector<16x256xf32>
    %33 = arith.mulf %32, %31 : vector<16x256xf32>
    %34 = arith.mulf %21, %33 : vector<16x256xf32>
    %35 = arith.truncf %34 : vector<16x256xf32> to vector<16x256xbf16>
    %c0_12 = arith.constant 0 : index
    %c0_13 = arith.constant 0 : index
    %36 = vector.load %arg4[%c0_12, %c0_13] : memref<256x768xbf16, #tpu.memory_space<vmem>>, vector<256x768xbf16>
    %cst_14 = arith.constant dense<0.000000e+00> : vector<16x768xf32>
    %37 = tpu.matmul %35, %36, %cst_14 {dimension_numbers = #tpu.dot_dimension_numbers<[1], [0], [0], [1], [0, 0, 1, 1], [], []>} : vector<16x256xbf16>, vector<256x768xbf16>, vector<16x768xf32> -> vector<16x768xf32>
    %38 = vector.extract_strided_slice %37 {offsets = [0, 0], sizes = [16, 256], strides = [1, 1]} : vector<16x768xf32> to vector<16x256xf32>
    %39 = vector.extract_strided_slice %37 {offsets = [0, 256], sizes = [16, 256], strides = [1, 1]} : vector<16x768xf32> to vector<16x256xf32>
    %40 = vector.extract_strided_slice %37 {offsets = [0, 512], sizes = [16, 256], strides = [1, 1]} : vector<16x768xf32> to vector<16x256xf32>
    %c1_i32_15 = arith.constant 1 : i32
    %41 = tpu.dynamic_rotate %38 by %c1_i32_15 dim 0 : vector<16x256xf32>, i32 -> vector<16x256xf32>
    %c15_i32_16 = arith.constant 15 : i32
    %42 = tpu.dynamic_rotate %40 by %c15_i32_16 dim 0 : vector<16x256xf32>, i32 -> vector<16x256xf32>
    %cst_17 = arith.constant 0.000000e+00 : f32
    %43 = vector.broadcast %cst_17 : f32 to vector<16x256xf32>
    %44 = arith.select %3, %43, %41 : vector<16x256xi1>, vector<16x256xf32>
    %cst_18 = arith.constant 0.000000e+00 : f32
    %45 = vector.broadcast %cst_18 : f32 to vector<16x256xf32>
    %46 = arith.select %5, %45, %42 : vector<16x256xi1>, vector<16x256xf32>
    %47 = arith.addf %44, %39 : vector<16x256xf32>
    %48 = arith.addf %47, %46 : vector<16x256xf32>
    %49 = arith.truncf %48 : vector<16x256xf32> to vector<16x256xbf16>
    %c0_19 = arith.constant 0 : index
    %c0_20 = arith.constant 0 : index
    %50 = vector.load %arg5[%c0_19, %c0_20] : memref<16x256xbf16, #tpu.memory_space<vmem>>, vector<16x256xbf16>
    tpu.vector_store %arg5[%c0_19, %c0_20], %49 {strides = array<i32>} : memref<16x256xbf16, #tpu.memory_space<vmem>>, vector<16x256xbf16>,
    return
  }
  func.func @transform_0(%arg0: i32) -> (i32, i32) {
    %c0_i32 = arith.constant 0 : i32
    %c0_i32_0 = arith.constant 0 : i32
    return %arg0, %c0_i32 : i32, i32
  }
  func.func @transform_1(%arg0: i32) -> (i32, i32) {
    %c0_i32 = arith.constant 0 : i32
    %c0_i32_0 = arith.constant 0 : i32
    %c0_i32_1 = arith.constant 0 : i32
    return %c0_i32, %c0_i32_0 : i32, i32
  }
  func.func @transform_2(%arg0: i32) -> (i32, i32) {
    %c0_i32 = arith.constant 0 : i32
    %c0_i32_0 = arith.constant 0 : i32
    %c0_i32_1 = arith.constant 0 : i32
    return %c0_i32, %c0_i32_0 : i32, i32
  }
  func.func @transform_3(%arg0: i32) -> (i32, i32) {
    %c0_i32 = arith.constant 0 : i32
    %c0_i32_0 = arith.constant 0 : i32
    %c0_i32_1 = arith.constant 0 : i32
    return %c0_i32, %c0_i32_0 : i32, i32
  }
  func.func @transform_4(%arg0: i32) -> (i32, i32) {
    %c0_i32 = arith.constant 0 : i32
    %c0_i32_0 = arith.constant 0 : i32
    return %arg0, %c0_i32 : i32, i32
  }
}

</mosaic_0001>

<bundles_post_ra>
// kernel: tpu_custom_call.1
= control target key start
LH: loop header
LB: loop body
LE: loop exit
PB: predicated region body
PF: predicated region fallthrough
CT: control target
= control target key end

     0   :  { %9 = vsyncpa [#allocation3], 0  ;;  %s6104_s0 = inlined_call_operand.hbm [shape: bf16[32,1024], index: 0, kind: input, shape index: {}]   ;;  %s6105_s1 = inlined_call_operand.hbm [shape: bf16[1024,768], index: 1, kind: input, shape index: {}]   ;;  %s6106_s2 = inlined_call_operand.hbm [shape: f32[1,256], index: 2, kind: input, shape index: {}]   ;;  %s6107_s3 = inlined_call_operand.hbm [shape: bf16[256,768], index: 3, kind: input, shape index: {}]   ;;  %s6108_s4 = inlined_call_operand.hbm [shape: bf16[32,256], index: 4, kind: output, shape index: {}]  }
   0x1   :  { %11 = vsyncpa [#allocation3 + $0x1], 0 }
   0x2   :  { %12 = vsyncpa [#allocation6], 0 }
   0x3   :  { %13 = vsyncpa [#allocation9], 0 }
   0x4   :  { %14 = vsyncpa [#allocation4], 0 }
   0x5   :  { %16 = vsyncpa [#allocation4 + $0x1], 0  ;;  %s5683_s15 = smov 0   ;;  %s5685_s16 = smov 0  }
   0x6   :  { %s5687_s17 = smov 0   ;;  %s5689_s18 = smov 0  }
   0x7 LB: > { %s5704_s19 = sadd.s32 4294967295, %s5645_s18   ;;  %s4092_s20 = sadd.s32 4294967294, %s5645_s18   ;;  %s5645_s18 = sphi %s5689_s18, %s6131_s18   ;;  %s5641_s17 = sphi %s5687_s17, %s6130_s17   ;;  %s5637_s16 = sphi %s5685_s16, %s6129_s16   ;;  %s5633_s15 = sphi %s5683_s15, %s6128_s15  }
   0x8   : > { %p42_p0 = scmp.ne.s32.totalorder %s5637_s16, %s5633_s15  ;;  %p6109_p1 = scmp.eq.s32.totalorder %s5704_s19, 0 }
   0x9   : > { %p135_p3 = scmp.eq.s32.totalorder %s4092_s20, 1  ;;  %p4093_p5 = scmp.ge.s32.totalorder %s5645_s18, 1 }
   0xa   : > { %p5713_p4 = por %p6109_p1, %p42_p0  ;;  %p142_p7 = scmp.lt.s32.totalorder %s5645_s18, 3 }
   0xb   : > { %p5718_p6 = por %p135_p3, %p42_p0  ;;  %s5647_s24 = smov [#allocation5]  }
   0xc   : > { %s6112_s21 = scalar_select %p5713_p4, 1, 0 }
   0xd   : > { %s6113_s22 = scalar_select %p5718_p6, 1, 0 }
   0xe   : > { %p5723_p8 = pnand %p4093_p5, %p142_p7  ;;  %s154_s25 = sshll.u32 %s5647_s24, 4  ;;  %s5727_s25 = int_to_ptr.vmem [resolvable:$true] %s154_s25 }
   0xf   : > { %s5648_s27 = smov [#allocation7]   ;;  %s5649_s29 = smov [#allocation8]  }
  0x10   : > { %s6114_s23 = scalar_select %p5723_p8, 1, 0 }
  0x11   : > { %p4662_p9 = pneg %p5723_p8  ;;  %s168_s28 = sshll.u32 %s5648_s27, 4  ;;  %s5738_s28 = int_to_ptr.vmem [resolvable:$true] %s168_s28 }
  0x12   : > { %s5740_s30 = sshll.u32 %s5649_s29, 4  ;;  %s5457_s7 = scalar_lea.hbm %s6105_s1, 49152  ;;  %s179_s30 = int_to_ptr.vmem [resolvable:$true] %s5740_s30 }
  0x13   : > { %p5734_p11 = pnand %p4662_p9, %p6109_p1  ;;  %p5458_p12 = scmp.ne.s32.totalorder %s6105_s1, %s5457_s7 }
  0x14   : > { %p5464_p5 = scmp.lt.u32.totalorder %s5457_s7, %s6105_s1 }
  0x15   : > { %p5750_p13 = pneg %p5734_p11 }
  0x17   : > { %p5460_p0 = pnand %p5750_p13, %p5458_p12 }
  0x19   : > { %p5461_p3 = pneg %p5460_p0 }
  0x1b   : > { %p5466_p7 = pnand %p5464_p5, %p5461_p3 }
  0x1d   : > { %5469 = shalt.err (!%p5466_p7)
}
  0x1e   : > { %s5470_s13 = scalar_lea.vmem %s5727_s25, 49152  ;;  %p5478_p2 = scmp.lt.s32.totalorder %s5727_s25, %s5727_s25 }
  0x1f   : > { %p5471_p9 = scmp.ne.s32.totalorder %s5727_s25, %s5470_s13  ;;  %p5479_p6 = scmp.lt.s32.totalorder %s5470_s13, %s5470_s13 }
  0x21   : > { %p5473_p10 = pnand %p5471_p9, %p5750_p13  ;;  %p5480_p12 = por %p5479_p6, %p5478_p2 }
  0x23   : > { %p5474_p1 = pneg %p5473_p10 }
  0x25   : > { %p5481_p0 = pnand %p5480_p12, %p5474_p1 }
  0x27   : > { %5484 = shalt.err (!%p5481_p0)
}
  0x28   : > { %s5650_s14 = smov 384   ;;  %s5651_s20 = smov 24  }
  0x29   : > { %4665 = dma.hbm_to_vmem [thread:$0]  (!%p5734_p11), %s6105_s1, 49152, %s5727_s25, [#allocation6], %s5650_s14, %s5650_s14, %s5651_s20  }
  0x2a   : > { %s5485_s6 = scalar_lea.hbm %s6106_s2, 32 }
  0x2b   : > { %p5486_p1 = scmp.ne.s32.totalorder %s6106_s2, %s5485_s6  ;;  %p5492_p10 = scmp.lt.u32.totalorder %s5485_s6, %s6106_s2 }
  0x2d   : > { %p5488_p2 = pnand %p5486_p1, %p5750_p13 }
  0x2f   : > { %p5489_p6 = pneg %p5488_p2 }
  0x31   : > { %p5494_p3 = pnand %p5492_p10, %p5489_p6 }
  0x33   : > { %5497 = shalt.err (!%p5494_p3)
}
  0x34   : > { %s5498_s25 = scalar_lea.vmem %s5738_s28, 32  ;;  %p5506_p12 = scmp.lt.s32.totalorder %s5738_s28, %s5738_s28 }
  0x35   : > { %p5499_p5 = scmp.ne.s32.totalorder %s5738_s28, %s5498_s25  ;;  %p5507_p0 = scmp.lt.s32.totalorder %s5498_s25, %s5498_s25 }
  0x37   : > { %p5501_p7 = pnand %p5499_p5, %p5750_p13  ;;  %p5508_p1 = por %p5507_p0, %p5506_p12 }
  0x39   : > { %p5502_p9 = pneg %p5501_p7 }
  0x3b   : > { %p5509_p2 = pnand %p5508_p1, %p5502_p9 }
  0x3d   : > { %5512 = shalt.err (!%p5509_p2)
}
  0x3e   : > { %4668 = dma.hbm_to_vmem [thread:$0]  (!%p5734_p11), %s6106_s2, 32, %s5738_s28, [#allocation6]  }
  0x3f   : > { %s5513_s29 = scalar_lea.hbm %s6107_s3, 12288 }
  0x40   : > { %p5514_p6 = scmp.ne.s32.totalorder %s6107_s3, %s5513_s29  ;;  %p5520_p5 = scmp.lt.u32.totalorder %s5513_s29, %s6107_s3 }
  0x42   : > { %p5516_p10 = pnand %p5514_p6, %p5750_p13 }
  0x44   : > { %p5517_p3 = pneg %p5516_p10 }
  0x46   : > { %p5522_p7 = pnand %p5520_p5, %p5517_p3 }
  0x48   : > { %5525 = shalt.err (!%p5522_p7)
}
  0x49   : > { %s5526_s9 = scalar_lea.vmem %s179_s30, 12288  ;;  %p5534_p1 = scmp.lt.s32.totalorder %s179_s30, %s179_s30 }
  0x4a   : > { %p5527_p9 = scmp.ne.s32.totalorder %s179_s30, %s5526_s9  ;;  %p5535_p2 = scmp.lt.s32.totalorder %s5526_s9, %s5526_s9 }
  0x4c   : > { %p5529_p12 = pnand %p5527_p9, %p5750_p13  ;;  %p5536_p4 = por %p5535_p2, %p5534_p1 }
  0x4e   : > { %p5530_p0 = pneg %p5529_p12 }
  0x50   : > { %p5537_p8 = pnand %p5536_p4, %p5530_p0 }
  0x52   : > { %5540 = shalt.err (!%p5537_p8)
}
  0x53   : > { %4671 = dma.hbm_to_vmem [thread:$0]  (!%p5734_p11), %s6107_s3, 12288, %s179_s30, [#allocation9], %s5650_s14, %s5650_s14, %s5651_s20  }
  0x54   : > { %s5820_s10 = sadd.s32 1, %s5645_s18   ;;  %s29_s25 = sadd.s32 1, %s5641_s17 }
  0x55   : > { %s26_s26 = ssub.s32 %s5645_s18, %s5820_s10  ;;  %p36_p8 = scmp.ne.s32.totalorder %s5641_s17, %s5637_s16 }
  0x56   : > { %p27_p4 = scmp.eq.s32.totalorder %s26_s26, 0  ;;  %p37_p13 = scmp.eq.s32.totalorder %s5645_s18, 0 }
  0x57   : > { %p4683_p6 = scmp.lt.s32.totalorder %s5645_s18, 2  ;;  %p6117_p3 = scmp.eq.s32.totalorder %s5704_s19, 1 }
  0x58   : > { %s5830_s12 = scalar_select %p27_p4, %s5641_s17, %s29_s25  }
  0x59   : > { %p38_p10 = por %p37_p13, %p36_p8  ;;  %p5834_p5 = por %p6117_p3, %p36_p8 }
  0x5a   : > { %s192_s24 = sand.u32 1, %s5641_s17   ;;  %s4605_s27 = sshll.u32 %s5645_s18, 10 }
  0x5b   : > { %s4098_s30 = sshll.u32 %s192_s24, 6  ;;  %s5843_s29 = scalar_lea.hbm %s6104_s0, %s4605_s27 }
  0x5c   : > { %s196_s5 = scalar_lea.vmem [#allocation2], %s4098_s30  ;;  %p5845_p11 = pnand %p4683_p6, %p38_p10 }
  0x5d   : > { %s204_s6 = sshll.u32 %s196_s5, 4  ;;  %s5851_s8 = scalar_lea.sflag [#allocation3], %s192_s24  ;;  %s5849_s6 = int_to_ptr.vmem [resolvable:$true] %s204_s6 }
  0x5e   : > { %s5541_s9 = scalar_lea.hbm %s5843_s29, 1024  ;;  %p5543_p9 = pneg %p5845_p11 }
  0x5f   : > { %p5542_p7 = scmp.ne.s32.totalorder %s5843_s29, %s5541_s9  ;;  %s5546_s26 = scalar_lea.hbm %s6104_s0, 2048 }
  0x60   : > { %p5547_p1 = scmp.lt.u32.totalorder %s5843_s29, %s6104_s0  ;;  %p5548_p2 = scmp.lt.u32.totalorder %s5546_s26, %s5541_s9 }
  0x61   : > { %p5544_p12 = pnand %p5543_p9, %p5542_p7  ;;  %p5550_p8 = scmp.lt.u32.totalorder %s5541_s9, %s5843_s29 }
  0x62   : > { %p5549_p4 = por %p5548_p2, %p5547_p1 }
  0x63   : > { %p5545_p0 = pneg %p5544_p12 }
  0x64   : > { %p5551_p13 = por %p5550_p8, %p5549_p4 }
  0x66   : > { %p5552_p6 = pnand %p5551_p13, %p5545_p0 }
  0x68   : > { %5555 = shalt.err (!%p5552_p6)
}
  0x69   : > { %s5556_s24 = scalar_lea.vmem %s5849_s6, 1024  ;;  %s5652_s30 = smov [#allocation2]  }
  0x6a   : > { %p5557_p10 = scmp.ne.s32.totalorder %s5849_s6, %s5556_s24  ;;  %s5561_s14 = sshll.u32 %s5652_s30, 4  ;;  %s5562_s14 = int_to_ptr.vmem [resolvable:$false] %s5561_s14 }
  0x6b   : > { %s5563_s20 = scalar_lea.vmem %s5562_s14, 2048  ;;  %p5564_p12 = scmp.lt.s32.totalorder %s5849_s6, %s5562_s14 }
  0x6c   : > { %p5559_p3 = pnand %p5557_p10, %p5543_p9  ;;  %p5565_p1 = scmp.lt.s32.totalorder %s5563_s20, %s5556_s24 }
  0x6e   : > { %p5560_p7 = pneg %p5559_p3  ;;  %p5566_p2 = por %p5565_p1, %p5564_p12 }
  0x70   : > { %p5567_p4 = pnand %p5566_p2, %p5560_p7 }
  0x72   : > { %5570 = shalt.err (!%p5567_p4)
}
  0x73   : > { %s5653_s5 = smov 512   ;;  %s5654_s9 = smov 32  }
  0x74   : > { %4675 = dma.hbm_to_vmem [thread:$0]  (!%p5845_p11), %s5843_s29, 1024, %s5849_s6, %s5851_s8, %s5653_s5, %s5653_s5, %s5654_s9  }
  0x75   : > { %p6120_p9 = scmp.ne.s32.totalorder %s6114_s23, 0 }
  0x76   : > { %s5882_s28 = sand.u32 (!%p6120_p9), 1, %s5637_s16   ;;  %p6121_p0 = scmp.ne.s32.totalorder (!%p6120_p9), %s6112_s21, 0 }
  0x77   : > { %216 = sbr.rel (%p6120_p9) target bundleno = 1266 (0x4f2), region = 36  ;;  %s4103_s11 = sshll.u32 (!%p6120_p9), %s5882_s28, 6 }
  0x78   : > { %s219_s26 = scalar_lea.sflag (!%p6120_p9), [#allocation3], %s5882_s28  ;;  %s5886_s25 = scalar_lea.vmem (!%p6120_p9), [#allocation2], %s4103_s11 }
  0x7e   : > { %5616 = dma.done.wait (%p6121_p0), %s219_s26, 1024  }
  0x7f   : > { %5618 = vsyncadd (%p6121_p0), %s219_s26, 4294966272  ;;  %p6122_p11 = scmp.eq.s32.totalorder %s5704_s19, 0 }
  0x81   : > { %5620 = dma.done.wait (%p6122_p11), [#allocation6], 49184   ;;  %p6123_p8 = pmov %p6122_p11 }
  0x83   : > { %5622 = vsyncadd (%p6123_p8), [#allocation6], 4294918112  ;;  %p6124_p13 = pmov %p6123_p8 }
  0x84   : > { %p6125_p6 = pmov %p6123_p8 }
  0x85   : > { %5624 = dma.done.wait (%p6124_p13), [#allocation9], 12288  }
  0x86   : > { %5626 = vsyncadd (%p6125_p6), [#allocation9], 4294955008  ;;  %v4729_v0 = vld [vmem:[#allocation5 + $0x4] ss:$24 sps:$4 sm:$0xff]   ;;  %v4731_v1 = vld [vmem:[#allocation5] ss:$24 sps:$4 sm:$0xff]  }
  0x87   : > { %2620 = vmatprep.subr.bf16.mxu0 %v4729_v0  ;;  %v4732_v2 = vld [vmem:[#allocation5 + $0xc] ss:$24 sps:$4 sm:$0xff]   ;;  %v4736_v4 = vld [vmem:[#allocation5 + $0x8] ss:$24 sps:$4 sm:$0xff]   ;;  %v4738_v6 = vld [vmem:[#allocation5 + $0x3c] ss:$24 sps:$4 sm:$0xff]  }
  0x88   : > { %2621 = vmatpush1.bf16.msra.mxu0 %v4731_v1  ;;  %v4734_v3 = vld [vmem:[#allocation5 + $0x34] ss:$24 sps:$4 sm:$0xff]   ;;  %v4737_v5 = vld [vmem:[#allocation5 + $0x30] ss:$24 sps:$4 sm:$0xff]   ;;  %2792 = vmatprep.subr.bf16.mxu1 %v4732_v2  ;;  %v4740_v7 = vld [vmem:[#allocation5 + $0x64] ss:$24 sps:$4 sm:$0xff]  }
  0x89   : > { %2622 = vmatprep.subr.bf16.mxu0 %v4734_v3  ;;  %2793 = vmatpush1.bf16.msra.mxu1 %v4736_v4  ;;  %v4742_v8 = vld [vmem:[#allocation5 + $0x38] ss:$24 sps:$4 sm:$0xff]   ;;  %v4744_v10 = vld [vmem:[#allocation5 + $0x6c] ss:$24 sps:$4 sm:$0xff]   ;;  %v4748_v12 = vld [vmem:[#allocation5 + $0x68] ss:$24 sps:$4 sm:$0xff]  }
  0x8a   : > { %2794 = vmatprep.subr.bf16.mxu1 %v4738_v6  ;;  %v4743_v9 = vld [vmem:[#allocation5 + $0x60] ss:$24 sps:$4 sm:$0xff]   ;;  %v4746_v11 = vld [vmem:[#allocation5 + $0x94] ss:$24 sps:$4 sm:$0xff]   ;;  %v4749_v14 = vld [vmem:[#allocation5 + $0x90] ss:$24 sps:$4 sm:$0xff]  }
  0x8b   : > { %v4750_v13 = vld [vmem:[#allocation5 + $0x9c] ss:$24 sps:$4 sm:$0xff]   ;;  %v4754_v16 = vld [vmem:[#allocation5 + $0x98] ss:$24 sps:$4 sm:$0xff]   ;;  %v4756_v17 = vld [vmem:[#allocation5 + $0xcc] ss:$24 sps:$4 sm:$0xff]  }
  0x8c   : > { %2623 = vmatpush1.bf16.msra.mxu0 %v4737_v5  ;;  %v4752_v15 = vld [vmem:[#allocation5 + $0xc4] ss:$24 sps:$4 sm:$0xff]   ;;  %v4755_v18 = vld [vmem:[#allocation5 + $0xc0] ss:$24 sps:$4 sm:$0xff]   ;;  %v4758_v19 = vld [vmem:[#allocation5 + $0xf4] ss:$24 sps:$4 sm:$0xff]  }
  0x8d   : > { %2624 = vmatprep.subr.bf16.mxu0 %v4740_v7  ;;  %2795 = vmatpush1.bf16.msra.mxu1 %v4742_v8  ;;  %v4760_v20 = vld [vmem:[#allocation5 + $0xc8] ss:$24 sps:$4 sm:$0xff]   ;;  %v4762_v21 = vld [vmem:[#allocation5 + $0xfc] ss:$24 sps:$4 sm:$0xff]   ;;  %v4766_v24 = vld [vmem:[#allocation5 + $0xf8] ss:$24 sps:$4 sm:$0xff]  }
  0x8e   : > { %2796 = vmatprep.subr.bf16.mxu1 %v4744_v10  ;;  %v4761_v22 = vld [vmem:[#allocation5 + $0xf0] ss:$24 sps:$4 sm:$0xff]   ;;  %v4764_v23 = vld [vmem:[#allocation5 + $0x124] ss:$24 sps:$4 sm:$0xff]   ;;  %v4767_v26 = vld [vmem:[#allocation5 + $0x120] ss:$24 sps:$4 sm:$0xff]  }
  0x8f   : > { %v4768_v25 = vld [vmem:[#allocation5 + $0x12c] ss:$24 sps:$4 sm:$0xff]   ;;  %v4772_v28 = vld [vmem:[#allocation5 + $0x128] ss:$24 sps:$4 sm:$0xff]   ;;  %v4774_v29 = vld [vmem:[#allocation5 + $0x15c] ss:$24 sps:$4 sm:$0xff]  }
  0x90   : > { %2625 = vmatpush1.bf16.msra.mxu0 %v4743_v9  ;;  %v4770_v27 = vld [vmem:[#allocation5 + $0x154] ss:$24 sps:$4 sm:$0xff]   ;;  %v4773_v30 = vld [vmem:[#allocation5 + $0x150] ss:$24 sps:$4 sm:$0xff]   ;;  %v4776_v31 = vld [vmem:[#allocation5 + $0x184] ss:$24 sps:$4 sm:$0xff]  }
  0x91   : > { %2626 = vmatprep.subr.bf16.mxu0 %v4746_v11  ;;  %2797 = vmatpush1.bf16.msra.mxu1 %v4748_v12  ;;  %v4778_v32 = vld [vmem:[#allocation5 + $0x158] ss:$24 sps:$4 sm:$0xff]   ;;  %v4780_v33 = vld [vmem:[#allocation5 + $0x18c] ss:$24 sps:$4 sm:$0xff]   ;;  %v4784_v36 = vld [vmem:[#allocation5 + $0x188] ss:$24 sps:$4 sm:$0xff]  }
  0x92   : > { %2798 = vmatprep.subr.bf16.mxu1 %v4750_v13  ;;  %v4779_v34 = vld [vmem:[#allocation5 + $0x180] ss:$24 sps:$4 sm:$0xff]   ;;  %v4782_v35 = vld [vmem:[#allocation5 + $0x1b4] ss:$24 sps:$4 sm:$0xff]   ;;  %v4785_v38 = vld [vmem:[#allocation5 + $0x1b0] ss:$24 sps:$4 sm:$0xff]  }
  0x93   : > { %v4786_v37 = vld [vmem:[#allocation5 + $0x1bc] ss:$24 sps:$4 sm:$0xff]   ;;  %v4790_v40 = vld [vmem:[#allocation5 + $0x1b8] ss:$24 sps:$4 sm:$0xff]   ;;  %v4792_v41 = vld [vmem:[#allocation5 + $0x1ec] ss:$24 sps:$4 sm:$0xff]  }
  0x94   : > { %2627 = vmatpush1.bf16.msra.mxu0 %v4749_v14  ;;  %v4788_v39 = vld [vmem:[#allocation5 + $0x1e4] ss:$24 sps:$4 sm:$0xff]   ;;  %v4791_v42 = vld [vmem:[#allocation5 + $0x1e0] ss:$24 sps:$4 sm:$0xff]   ;;  %v4794_v43 = vld [vmem:[#allocation5 + $0x214] ss:$24 sps:$4 sm:$0xff]  }
  0x95   : > { %2628 = vmatprep.subr.bf16.mxu0 %v4752_v15  ;;  %2799 = vmatpush1.bf16.msra.mxu1 %v4754_v16  ;;  %v4796_v44 = vld [vmem:[#allocation5 + $0x1e8] ss:$24 sps:$4 sm:$0xff]   ;;  %v4798_v45 = vld [vmem:[#allocation5 + $0x21c] ss:$24 sps:$4 sm:$0xff]   ;;  %v4802_v51 = vld [vmem:[#allocation5 + $0x218] ss:$24 sps:$4 sm:$0xff]  }
  0x96   : > { %2800 = vmatprep.subr.bf16.mxu1 %v4756_v17  ;;  %v261_v46 = vld [vmem:[%s5886_s25] sm:$0xff]  ;;  %v4797_v48 = vld [vmem:[#allocation5 + $0x210] ss:$24 sps:$4 sm:$0xff]   ;;  %v4806_v54 = vld [vmem:[#allocation5 + $0x274] ss:$24 sps:$4 sm:$0xff]   ;;  %s4107_s21 = sshll.u32 %s5882_s28, 4 }
  0x97   : > { %v265_v47 = vld [vmem:[%s5886_s25 + $0x20] sm:$0xff]  ;;  %v4810_v56 = vld [vmem:[#allocation5 + $0x27c] ss:$24 sps:$4 sm:$0xff]   ;;  %v4809_v57 = vld [vmem:[#allocation5 + $0x270] ss:$24 sps:$4 sm:$0xff]   ;;  %s4609_s23 = sshll.u32 %s5704_s19, 8 }
  0x98   : > { %2629 = vmatpush1.bf16.msra.mxu0 %v4755_v18  ;;  %v5902_v49 = vcombine.high %v261_v46, %v265_v47  ;;  %v4800_v50 = vld [vmem:[#allocation5 + $0x244] ss:$24 sps:$4 sm:$0xff]   ;;  %v4803_v53 = vld [vmem:[#allocation5 + $0x240] ss:$24 sps:$4 sm:$0xff]   ;;  %v4818_v62 = vld [vmem:[#allocation5 + $0x2d4] ss:$24 sps:$4 sm:$0xff]   ;;  %v5906_v4 = vcombine.low %v261_v46, %v265_v47  ;;  %s6058_s27 = scalar_lea.hbm %s6108_s4, %s4609_s23 }
  0x99   : > { %2630 = vmatprep.subr.bf16.mxu0 %v4758_v19  ;;  %2801 = vmatpush1.bf16.msra.mxu1 %v4760_v20  ;;  %v4804_v52 = vld [vmem:[#allocation5 + $0x24c] ss:$24 sps:$4 sm:$0xff]   ;;  %v4808_v55 = vld [vmem:[#allocation5 + $0x248] ss:$24 sps:$4 sm:$0xff]   ;;  %v4814_v59 = vld [vmem:[#allocation5 + $0x278] ss:$24 sps:$4 sm:$0xff]  }
  0x9a   : > { %2802 = vmatprep.subr.bf16.mxu1 %v4762_v21  ;;  %2652 = vmatprep.mubr.bf16.mxu0 %v5902_v49  ;;  %v4812_v58 = vld [vmem:[#allocation5 + $0x2a4] ss:$24 sps:$4 sm:$0xff]   ;;  %v4815_v61 = vld [vmem:[#allocation5 + $0x2a0] ss:$24 sps:$4 sm:$0xff]   ;;  %v4821_v1 = vld [vmem:[#allocation5 + $0x2d0] ss:$24 sps:$4 sm:$0xff]  }
  0x9b   : > { %2824 = vmatprep.mubr.bf16.mxu1 %v5902_v49  ;;  %v4816_v60 = vld [vmem:[#allocation5 + $0x2ac] ss:$24 sps:$4 sm:$0xff]   ;;  %v4820_v63 = vld [vmem:[#allocation5 + $0x2a8] ss:$24 sps:$4 sm:$0xff]   ;;  %v4822_v0 = vld [vmem:[#allocation5 + $0x2dc] ss:$24 sps:$4 sm:$0xff]  }
  0x9c   : > { %2631 = vmatpush1.bf16.msra.mxu0 %v4761_v22  ;;  %v4826_v2 = vld [vmem:[#allocation5 + $0x304] ss:$24 sps:$4 sm:$0xff]   ;;  %v4827_v3 = vld [vmem:[#allocation5 + $0x2d8] ss:$24 sps:$4 sm:$0xff]   ;;  %v4833_v7 = vld [vmem:[#allocation5 + $0x334] ss:$24 sps:$4 sm:$0xff]  }
  0x9d   : > { %2632 = vmatprep.subr.bf16.mxu0 %v4764_v23  ;;  %2803 = vmatpush1.bf16.msra.mxu1 %v4766_v24  ;;  %v4830_v5 = vld [vmem:[#allocation5 + $0x30c] ss:$24 sps:$4 sm:$0xff]   ;;  %v4824_v6 = vld [vmem:[#allocation5 + $0x300] ss:$24 sps:$4 sm:$0xff]   ;;  %v4836_v9 = vld [vmem:[#allocation5 + $0x33c] ss:$24 sps:$4 sm:$0xff]  }
  0x9e   : > { %2804 = vmatprep.subr.bf16.mxu1 %v4768_v25  ;;  %v4828_v8 = vld [vmem:[#allocation5 + $0x308] ss:$24 sps:$4 sm:$0xff]   ;;  %v4839_v11 = vld [vmem:[#allocation5 + $0x364] ss:$24 sps:$4 sm:$0xff]   ;;  %v4834_v12 = vld [vmem:[#allocation5 + $0x338] ss:$24 sps:$4 sm:$0xff]  }
  0x9f   : > { %v4831_v10 = vld [vmem:[#allocation5 + $0x330] ss:$24 sps:$4 sm:$0xff]   ;;  %v4842_v13 = vld [vmem:[#allocation5 + $0x36c] ss:$24 sps:$4 sm:$0xff]   ;;  %v4837_v14 = vld [vmem:[#allocation5 + $0x360] ss:$24 sps:$4 sm:$0xff]  }
  0xa0   : > { %2633 = vmatpush1.bf16.msra.mxu0 %v4767_v26  ;;  %v4845_v15 = vld [vmem:[#allocation5 + $0x394] ss:$24 sps:$4 sm:$0xff]   ;;  %v4840_v16 = vld [vmem:[#allocation5 + $0x368] ss:$24 sps:$4 sm:$0xff]   ;;  %v4851_v19 = vld [vmem:[#allocation5 + $0x3c4] ss:$24 sps:$4 sm:$0xff]  }
  0xa1   : > { %2634 = vmatprep.subr.bf16.mxu0 %v4770_v27  ;;  %2805 = vmatpush1.bf16.msra.mxu1 %v4772_v28  ;;  %v4848_v17 = vld [vmem:[#allocation5 + $0x39c] ss:$24 sps:$4 sm:$0xff]   ;;  %v4843_v18 = vld [vmem:[#allocation5 + $0x390] ss:$24 sps:$4 sm:$0xff]   ;;  %v4854_v21 = vld [vmem:[#allocation5 + $0x3cc] ss:$24 sps:$4 sm:$0xff]  }
  0xa2   : > { %2806 = vmatprep.subr.bf16.mxu1 %v4774_v29  ;;  %v4846_v20 = vld [vmem:[#allocation5 + $0x398] ss:$24 sps:$4 sm:$0xff]   ;;  %v4857_v23 = vld [vmem:[#allocation5 + $0x3f4] ss:$24 sps:$4 sm:$0xff]   ;;  %v4852_v24 = vld [vmem:[#allocation5 + $0x3c8] ss:$24 sps:$4 sm:$0xff]  }
  0xa3   : > { %v4849_v22 = vld [vmem:[#allocation5 + $0x3c0] ss:$24 sps:$4 sm:$0xff]   ;;  %v4860_v25 = vld [vmem:[#allocation5 + $0x3fc] ss:$24 sps:$4 sm:$0xff]   ;;  %v4855_v26 = vld [vmem:[#allocation5 + $0x3f0] ss:$24 sps:$4 sm:$0xff]  }
  0xa4   : > { %2635 = vmatpush1.bf16.msra.mxu0 %v4773_v30  ;;  %v4863_v27 = vld [vmem:[#allocation5 + $0x424] ss:$24 sps:$4 sm:$0xff]   ;;  %v4858_v28 = vld [vmem:[#allocation5 + $0x3f8] ss:$24 sps:$4 sm:$0xff]   ;;  %v5911_v30 = vld [vmem:[%s5886_s25 + $0x8] sm:$0xff]  ;;  %s258_s29 = scalar_lea.vmem [#allocation10], %s4107_s21 }
  0xa5   : > { %2636 = vmatprep.subr.bf16.mxu0 %v4776_v31  ;;  %2807 = vmatpush1.bf16.msra.mxu1 %v4778_v32  ;;  %v4866_v29 = vld [vmem:[#allocation5 + $0x42c] ss:$24 sps:$4 sm:$0xff]   ;;  %v4861_v32 = vld [vmem:[#allocation5 + $0x420] ss:$24 sps:$4 sm:$0xff]   ;;  %s3990_s6 = sshll.u32 %s258_s29, 4  ;;  %s3976_s19 = scalar_lea.sflag [#allocation4], %s5882_s28  ;;  %s6060_s6 = int_to_ptr.vmem [resolvable:$true] %s3990_s6 }
  0xa6   : > { %2808 = vmatprep.subr.bf16.mxu1 %v4780_v33  ;;  %v5914_v31 = vld [vmem:[%s5886_s25 + $0x28] sm:$0xff]  ;;  %v4887_v46 = vld [vmem:[#allocation5 + $0x4e4] ss:$24 sps:$4 sm:$0xff]   ;;  %v4882_v47 = vld [vmem:[#allocation5 + $0x4b8] ss:$24 sps:$4 sm:$0xff]   ;;  %s5571_s24 = scalar_lea.vmem %s6060_s6, 256 }
  0xa7   : > { %v5918_v33 = vcombine.high %v5911_v30, %v5914_v31  ;;  %p5572_p10 = scmp.ne.s32.totalorder %s6060_s6, %s5571_s24  ;;  %s5655_s30 = smov [#allocation10]  }
  0xa8   : > { %2637 = vmatpush1.bf16.msra.mxu0 %v4779_v34  ;;  %v4869_v34 = vld [vmem:[#allocation5 + $0x454] ss:$24 sps:$4 sm:$0xff]   ;;  %s5575_s14 = sshll.u32 %s5655_s30, 4  ;;  %s5576_s14 = int_to_ptr.vmem [resolvable:$false] %s5575_s14 }
  0xa9   : > { %2638 = vmatprep.subr.bf16.mxu0 %v4782_v35  ;;  %2809 = vmatpush1.bf16.msra.mxu1 %v4784_v36  ;;  %v4864_v35 = vld [vmem:[#allocation5 + $0x428] ss:$24 sps:$4 sm:$0xff]   ;;  %v4872_v36 = vld [vmem:[#allocation5 + $0x45c] ss:$24 sps:$4 sm:$0xff]   ;;  %p5573_p3 = pnand %p5572_p10, %p5834_p5  ;;  %s5577_s20 = scalar_lea.vmem %s5576_s14, 512 }
  0xaa   : > { %2810 = vmatprep.subr.bf16.mxu1 %v4786_v37  ;;  %v4867_v37 = vld [vmem:[#allocation5 + $0x450] ss:$24 sps:$4 sm:$0xff]   ;;  %p5578_p12 = scmp.lt.s32.totalorder %s6060_s6, %s5576_s14  ;;  %p5579_p1 = scmp.lt.s32.totalorder %s5577_s20, %s5571_s24 }
  0xab   : > { %p5574_p7 = pneg %p5573_p3 }
  0xac   : > { %2639 = vmatpush1.bf16.msra.mxu0 %v4785_v38  ;;  %v4875_v38 = vld [vmem:[#allocation5 + $0x484] ss:$24 sps:$4 sm:$0xff]   ;;  %p5580_p2 = por %p5579_p1, %p5578_p12 }
  0xad   : > { %2640 = vmatprep.subr.bf16.mxu0 %v4788_v39  ;;  %2811 = vmatpush1.bf16.msra.mxu1 %v4790_v40  ;;  %v4870_v39 = vld [vmem:[#allocation5 + $0x458] ss:$24 sps:$4 sm:$0xff]   ;;  %v4878_v40 = vld [vmem:[#allocation5 + $0x48c] ss:$24 sps:$4 sm:$0xff]  }
  0xae   : > { %2812 = vmatprep.subr.bf16.mxu1 %v4792_v41  ;;  %v4873_v41 = vld [vmem:[#allocation5 + $0x480] ss:$24 sps:$4 sm:$0xff]   ;;  %p5581_p4 = pnand %p5580_p2, %p5574_p7 }
  0xb0   : > { %2641 = vmatpush1.bf16.msra.mxu0 %v4791_v42  ;;  %v4881_v42 = vld [vmem:[#allocation5 + $0x4b4] ss:$24 sps:$4 sm:$0xff]  }
  0xb1   : > { %2642 = vmatprep.subr.bf16.mxu0 %v4794_v43  ;;  %2813 = vmatpush1.bf16.msra.mxu1 %v4796_v44  ;;  %v4876_v43 = vld [vmem:[#allocation5 + $0x488] ss:$24 sps:$4 sm:$0xff]   ;;  %v4884_v44 = vld [vmem:[#allocation5 + $0x4bc] ss:$24 sps:$4 sm:$0xff]  }
  0xb2   : > { %2814 = vmatprep.subr.bf16.mxu1 %v4798_v45  ;;  %v4879_v45 = vld [vmem:[#allocation5 + $0x4b0] ss:$24 sps:$4 sm:$0xff]  }
  0xb4   : > { %2643 = vmatpush1.bf16.msra.mxu0 %v4797_v48  ;;  %v4890_v48 = vld [vmem:[#allocation5 + $0x4ec] ss:$24 sps:$4 sm:$0xff]  }
  0xb5   : > { %2644 = vmatprep.subr.bf16.mxu0 %v4800_v50  ;;  %2815 = vmatpush1.bf16.msra.mxu1 %v4802_v51  ;;  %v4885_v50 = vld [vmem:[#allocation5 + $0x4e0] ss:$24 sps:$4 sm:$0xff]   ;;  %v4893_v51 = vld [vmem:[#allocation5 + $0x514] ss:$24 sps:$4 sm:$0xff]  }
  0xb6   : > { %2816 = vmatprep.subr.bf16.mxu1 %v4804_v52  ;;  %v4888_v52 = vld [vmem:[#allocation5 + $0x4e8] ss:$24 sps:$4 sm:$0xff]  }
  0xb8   : > { %2645 = vmatpush1.bf16.msra.mxu0 %v4803_v53  ;;  %v4896_v53 = vld [vmem:[#allocation5 + $0x51c] ss:$24 sps:$4 sm:$0xff]  }
  0xb9   : > { %2646 = vmatprep.subr.bf16.mxu0 %v4806_v54  ;;  %2817 = vmatpush1.bf16.msra.mxu1 %v4808_v55  ;;  %v4891_v54 = vld [vmem:[#allocation5 + $0x510] ss:$24 sps:$4 sm:$0xff]   ;;  %v4899_v55 = vld [vmem:[#allocation5 + $0x544] ss:$24 sps:$4 sm:$0xff]  }
  0xba   : > { %2818 = vmatprep.subr.bf16.mxu1 %v4810_v56  ;;  %v4894_v56 = vld [vmem:[#allocation5 + $0x518] ss:$24 sps:$4 sm:$0xff]  }
  0xbc   : > { %2647 = vmatpush1.bf16.msra.mxu0 %v4809_v57  ;;  %v4902_v57 = vld [vmem:[#allocation5 + $0x54c] ss:$24 sps:$4 sm:$0xff]  }
  0xbd   : > { %2648 = vmatprep.subr.bf16.mxu0 %v4812_v58  ;;  %2819 = vmatpush1.bf16.msra.mxu1 %v4814_v59  ;;  %v4897_v58 = vld [vmem:[#allocation5 + $0x540] ss:$24 sps:$4 sm:$0xff]   ;;  %v4905_v59 = vld [vmem:[#allocation5 + $0x574] ss:$24 sps:$4 sm:$0xff]  }
  0xbe   : > { %2820 = vmatprep.subr.bf16.mxu1 %v4816_v60  ;;  %v4900_v60 = vld [vmem:[#allocation5 + $0x548] ss:$24 sps:$4 sm:$0xff]  }
  0xc0   : > { %2649 = vmatpush1.bf16.msra.mxu0 %v4815_v61  ;;  %v4908_v61 = vld [vmem:[#allocation5 + $0x57c] ss:$24 sps:$4 sm:$0xff]  }
  0xc1   : > { %2650 = vmatprep.subr.bf16.mxu0 %v4818_v62  ;;  %2821 = vmatpush1.bf16.msra.mxu1 %v4820_v63  ;;  %v4903_v62 = vld [vmem:[#allocation5 + $0x570] ss:$24 sps:$4 sm:$0xff]   ;;  %v4911_v63 = vld [vmem:[#allocation5 + $0x5a4] ss:$24 sps:$4 sm:$0xff]  }
  0xc2   : > { %2822 = vmatprep.subr.bf16.mxu1 %v4822_v0  ;;  %v4906_v0 = vld [vmem:[#allocation5 + $0x578] ss:$24 sps:$4 sm:$0xff]  }
  0xc4   : > { %2651 = vmatpush1.bf16.msra.mxu0 %v4821_v1  ;;  %v4914_v1 = vld [vmem:[#allocation5 + $0x5ac] ss:$24 sps:$4 sm:$0xff]  }
  0xc5   : > { %2663 = vmatprep.subr.bf16.mxu0 %v4826_v2  ;;  %2823 = vmatpush1.bf16.msra.mxu1 %v4827_v3  ;;  %v4909_v2 = vld [vmem:[#allocation5 + $0x5a0] ss:$24 sps:$4 sm:$0xff]   ;;  %v4917_v3 = vld [vmem:[#allocation5 + $0x5d4] ss:$24 sps:$4 sm:$0xff]  }
  0xc6   : > { %2835 = vmatprep.subr.bf16.mxu1 %v4830_v5  ;;  %v4912_v5 = vld [vmem:[#allocation5 + $0x5a8] ss:$24 sps:$4 sm:$0xff]  }
  0xc7   : > { %2653 = vmatmul.mubr.bf16.vlgmr.msra.gmra.mrb[0].mxu0 %v5906_v4 }
  0xc8   : > { %2664 = vmatpush1.bf16.msra.mxu0 %v4824_v6  ;;  %2825 = vmatmul.mubr.bf16.vlgmr.msra.gmra.mrb[0].mxu1 %v5906_v4  ;;  %v4920_v6 = vld [vmem:[#allocation5 + $0x5dc] ss:$24 sps:$4 sm:$0xff]  }
  0xc9   : > { %2665 = vmatprep.subr.bf16.mxu0 %v4833_v7  ;;  %2836 = vmatpush1.bf16.msra.mxu1 %v4828_v8  ;;  %v4915_v7 = vld [vmem:[#allocation5 + $0x5d0] ss:$24 sps:$4 sm:$0xff]   ;;  %v4923_v8 = vld [vmem:[#allocation5 + $0x604] ss:$24 sps:$4 sm:$0xff]  }
  0xca   : > { %2837 = vmatprep.subr.bf16.mxu1 %v4836_v9  ;;  %2695 = vmatprep.mubr.bf16.mxu0 %v5918_v33  ;;  %v4918_v9 = vld [vmem:[#allocation5 + $0x5d8] ss:$24 sps:$4 sm:$0xff]  }
  0xcb   : > { %2867 = vmatprep.mubr.bf16.mxu1 %v5918_v33 }
  0xcc   : > { %2666 = vmatpush1.bf16.msra.mxu0 %v4831_v10  ;;  %v5924_v10 = vcombine.low %v5911_v30, %v5914_v31  ;;  %v4950_v30 = vld [vmem:[#allocation5 + $0x6cc] ss:$24 sps:$4 sm:$0xff]   ;;  %v4945_v31 = vld [vmem:[#allocation5 + $0x6c0] ss:$24 sps:$4 sm:$0xff]  }
  0xcd   : > { %2667 = vmatprep.subr.bf16.mxu0 %v4839_v11  ;;  %2838 = vmatpush1.bf16.msra.mxu1 %v4834_v12  ;;  %v4926_v11 = vld [vmem:[#allocation5 + $0x60c] ss:$24 sps:$4 sm:$0xff]   ;;  %v4921_v12 = vld [vmem:[#allocation5 + $0x600] ss:$24 sps:$4 sm:$0xff]  }
  0xce   : > { %2839 = vmatprep.subr.bf16.mxu1 %v4842_v13  ;;  %v4929_v13 = vld [vmem:[#allocation5 + $0x634] ss:$24 sps:$4 sm:$0xff]  }
  0xd0   : > { %2668 = vmatpush1.bf16.msra.mxu0 %v4837_v14  ;;  %v4924_v14 = vld [vmem:[#allocation5 + $0x608] ss:$24 sps:$4 sm:$0xff]  }
  0xd1   : > { %2669 = vmatprep.subr.bf16.mxu0 %v4845_v15  ;;  %2840 = vmatpush1.bf16.msra.mxu1 %v4840_v16  ;;  %v5927_v15 = vld [vmem:[%s5886_s25 + $0x10] sm:$0xff] }
  0xd2   : > { %2841 = vmatprep.subr.bf16.mxu1 %v4848_v17  ;;  %v5930_v16 = vld [vmem:[%s5886_s25 + $0x30] sm:$0xff] }
  0xd3   : > { %v4932_v17 = vld [vmem:[#allocation5 + $0x63c] ss:$24 sps:$4 sm:$0xff]  }
  0xd4   : > { %2670 = vmatpush1.bf16.msra.mxu0 %v4843_v18  ;;  %v5935_v18 = vcombine.high %v5927_v15, %v5930_v16 }
  0xd5   : > { %2671 = vmatprep.subr.bf16.mxu0 %v4851_v19  ;;  %2842 = vmatpush1.bf16.msra.mxu1 %v4846_v20  ;;  %v4927_v19 = vld [vmem:[#allocation5 + $0x630] ss:$24 sps:$4 sm:$0xff]   ;;  %v4935_v20 = vld [vmem:[#allocation5 + $0x664] ss:$24 sps:$4 sm:$0xff]  }
  0xd6   : > { %2843 = vmatprep.subr.bf16.mxu1 %v4854_v21  ;;  %v4930_v21 = vld [vmem:[#allocation5 + $0x638] ss:$24 sps:$4 sm:$0xff]  }
  0xd8   : > { %2672 = vmatpush1.bf16.msra.mxu0 %v4849_v22  ;;  %v4938_v22 = vld [vmem:[#allocation5 + $0x66c] ss:$24 sps:$4 sm:$0xff]  }
  0xd9   : > { %2673 = vmatprep.subr.bf16.mxu0 %v4857_v23  ;;  %2844 = vmatpush1.bf16.msra.mxu1 %v4852_v24  ;;  %v4933_v23 = vld [vmem:[#allocation5 + $0x660] ss:$24 sps:$4 sm:$0xff]   ;;  %v4941_v24 = vld [vmem:[#allocation5 + $0x694] ss:$24 sps:$4 sm:$0xff]  }
  0xda   : > { %2845 = vmatprep.subr.bf16.mxu1 %v4860_v25  ;;  %v4936_v25 = vld [vmem:[#allocation5 + $0x668] ss:$24 sps:$4 sm:$0xff]  }
  0xdc   : > { %2674 = vmatpush1.bf16.msra.mxu0 %v4855_v26  ;;  %v4944_v26 = vld [vmem:[#allocation5 + $0x69c] ss:$24 sps:$4 sm:$0xff]  }
  0xdd   : > { %2675 = vmatprep.subr.bf16.mxu0 %v4863_v27  ;;  %2846 = vmatpush1.bf16.msra.mxu1 %v4858_v28  ;;  %v4939_v27 = vld [vmem:[#allocation5 + $0x690] ss:$24 sps:$4 sm:$0xff]   ;;  %v4947_v28 = vld [vmem:[#allocation5 + $0x6c4] ss:$24 sps:$4 sm:$0xff]  }
  0xde   : > { %2847 = vmatprep.subr.bf16.mxu1 %v4866_v29  ;;  %v4942_v29 = vld [vmem:[#allocation5 + $0x698] ss:$24 sps:$4 sm:$0xff]  }
  0xe0   : > { %2676 = vmatpush1.bf16.msra.mxu0 %v4861_v32  ;;  %v4953_v32 = vld [vmem:[#allocation5 + $0x6f4] ss:$24 sps:$4 sm:$0xff]  }
  0xe1   : > { %2677 = vmatprep.subr.bf16.mxu0 %v4869_v34  ;;  %2848 = vmatpush1.bf16.msra.mxu1 %v4864_v35  ;;  %v4948_v34 = vld [vmem:[#allocation5 + $0x6c8] ss:$24 sps:$4 sm:$0xff]   ;;  %v4956_v35 = vld [vmem:[#allocation5 + $0x6fc] ss:$24 sps:$4 sm:$0xff]  }
  0xe2   : > { %2849 = vmatprep.subr.bf16.mxu1 %v4872_v36  ;;  %v4951_v36 = vld [vmem:[#allocation5 + $0x6f0] ss:$24 sps:$4 sm:$0xff]  }
  0xe4   : > { %2678 = vmatpush1.bf16.msra.mxu0 %v4867_v37  ;;  %v4959_v37 = vld [vmem:[#allocation5 + $0x724] ss:$24 sps:$4 sm:$0xff]  }
  0xe5   : > { %2679 = vmatprep.subr.bf16.mxu0 %v4875_v38  ;;  %2850 = vmatpush1.bf16.msra.mxu1 %v4870_v39  ;;  %v4954_v38 = vld [vmem:[#allocation5 + $0x6f8] ss:$24 sps:$4 sm:$0xff]   ;;  %v4962_v39 = vld [vmem:[#allocation5 + $0x72c] ss:$24 sps:$4 sm:$0xff]  }
  0xe6   : > { %2851 = vmatprep.subr.bf16.mxu1 %v4878_v40  ;;  %v4957_v40 = vld [vmem:[#allocation5 + $0x720] ss:$24 sps:$4 sm:$0xff]  }
  0xe8   : > { %2680 = vmatpush1.bf16.msra.mxu0 %v4873_v41  ;;  %v4965_v41 = vld [vmem:[#allocation5 + $0x754] ss:$24 sps:$4 sm:$0xff]  }
  0xe9   : > { %2681 = vmatprep.subr.bf16.mxu0 %v4881_v42  ;;  %2852 = vmatpush1.bf16.msra.mxu1 %v4876_v43  ;;  %v4960_v42 = vld [vmem:[#allocation5 + $0x728] ss:$24 sps:$4 sm:$0xff]   ;;  %v4968_v43 = vld [vmem:[#allocation5 + $0x75c] ss:$24 sps:$4 sm:$0xff]  }
  0xea   : > { %2853 = vmatprep.subr.bf16.mxu1 %v4884_v44  ;;  %v4963_v44 = vld [vmem:[#allocation5 + $0x750] ss:$24 sps:$4 sm:$0xff]  }
  0xec   : > { %2682 = vmatpush1.bf16.msra.mxu0 %v4879_v45  ;;  %v4971_v45 = vld [vmem:[#allocation5 + $0x784] ss:$24 sps:$4 sm:$0xff]  }
  0xed   : > { %2683 = vmatprep.subr.bf16.mxu0 %v4887_v46  ;;  %2854 = vmatpush1.bf16.msra.mxu1 %v4882_v47  ;;  %v4966_v46 = vld [vmem:[#allocation5 + $0x758] ss:$24 sps:$4 sm:$0xff]   ;;  %v4974_v47 = vld [vmem:[#allocation5 + $0x78c] ss:$24 sps:$4 sm:$0xff]  }
  0xee   : > { %2855 = vmatprep.subr.bf16.mxu1 %v4890_v48  ;;  %v4969_v48 = vld [vmem:[#allocation5 + $0x780] ss:$24 sps:$4 sm:$0xff]  }
  0xf0   : > { %2684 = vmatpush1.bf16.msra.mxu0 %v4885_v50  ;;  %v4977_v50 = vld [vmem:[#allocation5 + $0x7b4] ss:$24 sps:$4 sm:$0xff]  }
  0xf1   : > { %2685 = vmatprep.subr.bf16.mxu0 %v4893_v51  ;;  %2856 = vmatpush1.bf16.msra.mxu1 %v4888_v52  ;;  %v4972_v51 = vld [vmem:[#allocation5 + $0x788] ss:$24 sps:$4 sm:$0xff]   ;;  %v4980_v52 = vld [vmem:[#allocation5 + $0x7bc] ss:$24 sps:$4 sm:$0xff]  }
  0xf2   : > { %2857 = vmatprep.subr.bf16.mxu1 %v4896_v53  ;;  %v4975_v53 = vld [vmem:[#allocation5 + $0x7b0] ss:$24 sps:$4 sm:$0xff]  }
  0xf4   : > { %2686 = vmatpush1.bf16.msra.mxu0 %v4891_v54  ;;  %v4983_v54 = vld [vmem:[#allocation5 + $0x7e4] ss:$24 sps:$4 sm:$0xff]  }
  0xf5   : > { %2687 = vmatprep.subr.bf16.mxu0 %v4899_v55  ;;  %2858 = vmatpush1.bf16.msra.mxu1 %v4894_v56  ;;  %v4978_v55 = vld [vmem:[#allocation5 + $0x7b8] ss:$24 sps:$4 sm:$0xff]   ;;  %v4986_v56 = vld [vmem:[#allocation5 + $0x7ec] ss:$24 sps:$4 sm:$0xff]  }
  0xf6   : > { %2859 = vmatprep.subr.bf16.mxu1 %v4902_v57  ;;  %v4981_v57 = vld [vmem:[#allocation5 + $0x7e0] ss:$24 sps:$4 sm:$0xff]  }
  0xf8   : > { %2688 = vmatpush1.bf16.msra.mxu0 %v4897_v58  ;;  %v4989_v58 = vld [vmem:[#allocation5 + $0x814] ss:$24 sps:$4 sm:$0xff]  }
  0xf9   : > { %2689 = vmatprep.subr.bf16.mxu0 %v4905_v59  ;;  %2860 = vmatpush1.bf16.msra.mxu1 %v4900_v60  ;;  %v4984_v59 = vld [vmem:[#allocation5 + $0x7e8] ss:$24 sps:$4 sm:$0xff]   ;;  %v4992_v60 = vld [vmem:[#allocation5 + $0x81c] ss:$24 sps:$4 sm:$0xff]  }
  0xfa   : > { %2861 = vmatprep.subr.bf16.mxu1 %v4908_v61  ;;  %v4987_v61 = vld [vmem:[#allocation5 + $0x810] ss:$24 sps:$4 sm:$0xff]  }
  0xfc   : > { %2690 = vmatpush1.bf16.msra.mxu0 %v4903_v62  ;;  %v4995_v62 = vld [vmem:[#allocation5 + $0x844] ss:$24 sps:$4 sm:$0xff]  }
  0xfd   : > { %2691 = vmatprep.subr.bf16.mxu0 %v4911_v63  ;;  %2862 = vmatpush1.bf16.msra.mxu1 %v4906_v0  ;;  %v4990_v63 = vld [vmem:[#allocation5 + $0x818] ss:$24 sps:$4 sm:$0xff]   ;;  %v4998_v0 = vld [vmem:[#allocation5 + $0x84c] ss:$24 sps:$4 sm:$0xff]  }
  0xfe   : > { %2863 = vmatprep.subr.bf16.mxu1 %v4914_v1  ;;  %v4993_v1 = vld [vmem:[#allocation5 + $0x840] ss:$24 sps:$4 sm:$0xff]  }
 0x100   : > { %2692 = vmatpush1.bf16.msra.mxu0 %v4909_v2  ;;  %v5001_v2 = vld [vmem:[#allocation5 + $0x874] ss:$24 sps:$4 sm:$0xff]  }
 0x101   : > { %2693 = vmatprep.subr.bf16.mxu0 %v4917_v3  ;;  %2864 = vmatpush1.bf16.msra.mxu1 %v4912_v5  ;;  %v4996_v3 = vld [vmem:[#allocation5 + $0x848] ss:$24 sps:$4 sm:$0xff]   ;;  %v5004_v5 = vld [vmem:[#allocation5 + $0x87c] ss:$24 sps:$4 sm:$0xff]  }
 0x102   : > { %2865 = vmatprep.subr.bf16.mxu1 %v4920_v6  ;;  %v4999_v6 = vld [vmem:[#allocation5 + $0x870] ss:$24 sps:$4 sm:$0xff]  }
 0x104   : > { %2694 = vmatpush1.bf16.msra.mxu0 %v4915_v7  ;;  %v5007_v7 = vld [vmem:[#allocation5 + $0x8a4] ss:$24 sps:$4 sm:$0xff]  }
 0x105   : > { %2706 = vmatprep.subr.bf16.mxu0 %v4923_v8  ;;  %2866 = vmatpush1.bf16.msra.mxu1 %v4918_v9  ;;  %v5002_v8 = vld [vmem:[#allocation5 + $0x878] ss:$24 sps:$4 sm:$0xff]   ;;  %v5010_v9 = vld [vmem:[#allocation5 + $0x8ac] ss:$24 sps:$4 sm:$0xff]  }
 0x106   : > { %2878 = vmatprep.subr.bf16.mxu1 %v4926_v11  ;;  %v5005_v11 = vld [vmem:[#allocation5 + $0x8a0] ss:$24 sps:$4 sm:$0xff]  }
 0x107   : > { %2696 = vmatmul.mubr.bf16.vlgmr.msra.gmra.mrb[0].mxu0 %v5924_v10 }
 0x108   : > { %2707 = vmatpush1.bf16.msra.mxu0 %v4921_v12  ;;  %2868 = vmatmul.mubr.bf16.vlgmr.msra.gmra.mrb[0].mxu1 %v5924_v10  ;;  %v5013_v12 = vld [vmem:[#allocation5 + $0x8d4] ss:$24 sps:$4 sm:$0xff]  }
 0x109   : > { %2708 = vmatprep.subr.bf16.mxu0 %v4929_v13  ;;  %2879 = vmatpush1.bf16.msra.mxu1 %v4924_v14  ;;  %v5008_v13 = vld [vmem:[#allocation5 + $0x8a8] ss:$24 sps:$4 sm:$0xff]  }
 0x10a   : > { %2738 = vmatprep.mubr.bf16.mxu0 %v5935_v18  ;;  %2880 = vmatprep.subr.bf16.mxu1 %v4932_v17  ;;  %v5011_v14 = vld [vmem:[#allocation5 + $0x8d0] ss:$24 sps:$4 sm:$0xff]   ;;  %v5016_v17 = vld [vmem:[#allocation5 + $0x8dc] ss:$24 sps:$4 sm:$0xff]  }
 0x10b   : > { %2910 = vmatprep.mubr.bf16.mxu1 %v5935_v18 }
 0x10c   : > { %2709 = vmatpush1.bf16.msra.mxu0 %v4927_v19  ;;  %v5019_v19 = vld [vmem:[#allocation5 + $0x904] ss:$24 sps:$4 sm:$0xff]  }
 0x10d   : > { %2710 = vmatprep.subr.bf16.mxu0 %v4935_v20  ;;  %2881 = vmatpush1.bf16.msra.mxu1 %v4930_v21  ;;  %v5941_v20 = vld [vmem:[%s5886_s25 + $0x18] sm:$0xff] }
 0x10e   : > { %2882 = vmatprep.subr.bf16.mxu1 %v4938_v22  ;;  %v5944_v21 = vld [vmem:[%s5886_s25 + $0x38] sm:$0xff] }
 0x10f   : > { %v5014_v22 = vld [vmem:[#allocation5 + $0x8d8] ss:$24 sps:$4 sm:$0xff]  }
 0x110   : > { %2711 = vmatpush1.bf16.msra.mxu0 %v4933_v23  ;;  %v5948_v23 = vcombine.low %v5927_v15, %v5930_v16  ;;  %v5031_v15 = vld [vmem:[#allocation5 + $0x964] ss:$24 sps:$4 sm:$0xff]   ;;  %v5029_v16 = vld [vmem:[#allocation5 + $0x960] ss:$24 sps:$4 sm:$0xff]  }
 0x111   : > { %2712 = vmatprep.subr.bf16.mxu0 %v4941_v24  ;;  %2883 = vmatpush1.bf16.msra.mxu1 %v4936_v25  ;;  %v5022_v24 = vld [vmem:[#allocation5 + $0x90c] ss:$24 sps:$4 sm:$0xff]   ;;  %v5017_v25 = vld [vmem:[#allocation5 + $0x900] ss:$24 sps:$4 sm:$0xff]  }
 0x112   : > { %2884 = vmatprep.subr.bf16.mxu1 %v4944_v26  ;;  %v5952_v26 = vcombine.high %v5941_v20, %v5944_v21 }
 0x114   : > { %2713 = vmatpush1.bf16.msra.mxu0 %v4939_v27  ;;  %v5025_v27 = vld [vmem:[#allocation5 + $0x934] ss:$24 sps:$4 sm:$0xff]  }
 0x115   : > { %2714 = vmatprep.subr.bf16.mxu0 %v4947_v28  ;;  %2885 = vmatpush1.bf16.msra.mxu1 %v4942_v29  ;;  %v5020_v28 = vld [vmem:[#allocation5 + $0x908] ss:$24 sps:$4 sm:$0xff]   ;;  %v5028_v29 = vld [vmem:[#allocation5 + $0x93c] ss:$24 sps:$4 sm:$0xff]  }
 0x116   : > { %2886 = vmatprep.subr.bf16.mxu1 %v4950_v30  ;;  %v5023_v30 = vld [vmem:[#allocation5 + $0x930] ss:$24 sps:$4 sm:$0xff]  }
 0x118   : > { %2715 = vmatpush1.bf16.msra.mxu0 %v4945_v31  ;;  %v5026_v31 = vld [vmem:[#allocation5 + $0x938] ss:$24 sps:$4 sm:$0xff]  }
 0x119   : > { %2716 = vmatprep.subr.bf16.mxu0 %v4953_v32  ;;  %2887 = vmatpush1.bf16.msra.mxu1 %v4948_v34  ;;  %v5034_v32 = vld [vmem:[#allocation5 + $0x96c] ss:$24 sps:$4 sm:$0xff]   ;;  %v5032_v34 = vld [vmem:[#allocation5 + $0x968] ss:$24 sps:$4 sm:$0xff]  }
 0x11a   : > { %2888 = vmatprep.subr.bf16.mxu1 %v4956_v35  ;;  %v5037_v35 = vld [vmem:[#allocation5 + $0x994] ss:$24 sps:$4 sm:$0xff]  }
 0x11c   : > { %2717 = vmatpush1.bf16.msra.mxu0 %v4951_v36  ;;  %v5040_v36 = vld [vmem:[#allocation5 + $0x99c] ss:$24 sps:$4 sm:$0xff]  }
 0x11d   : > { %2718 = vmatprep.subr.bf16.mxu0 %v4959_v37  ;;  %2889 = vmatpush1.bf16.msra.mxu1 %v4954_v38  ;;  %v5035_v37 = vld [vmem:[#allocation5 + $0x990] ss:$24 sps:$4 sm:$0xff]  }
 0x11e   : > { %2890 = vmatprep.subr.bf16.mxu1 %v4962_v39  ;;  %v5038_v38 = vld [vmem:[#allocation5 + $0x998] ss:$24 sps:$4 sm:$0xff]   ;;  %v5043_v39 = vld [vmem:[#allocation5 + $0x9c4] ss:$24 sps:$4 sm:$0xff]  }
 0x120   : > { %2719 = vmatpush1.bf16.msra.mxu0 %v4957_v40  ;;  %v5046_v40 = vld [vmem:[#allocation5 + $0x9cc] ss:$24 sps:$4 sm:$0xff]  }
 0x121   : > { %2720 = vmatprep.subr.bf16.mxu0 %v4965_v41  ;;  %2891 = vmatpush1.bf16.msra.mxu1 %v4960_v42  ;;  %v5041_v41 = vld [vmem:[#allocation5 + $0x9c0] ss:$24 sps:$4 sm:$0xff]  }
 0x122   : > { %2892 = vmatprep.subr.bf16.mxu1 %v4968_v43  ;;  %v5044_v42 = vld [vmem:[#allocation5 + $0x9c8] ss:$24 sps:$4 sm:$0xff]   ;;  %v5049_v43 = vld [vmem:[#allocation5 + $0x9f4] ss:$24 sps:$4 sm:$0xff]  }
 0x124   : > { %2721 = vmatpush1.bf16.msra.mxu0 %v4963_v44  ;;  %v5052_v44 = vld [vmem:[#allocation5 + $0x9fc] ss:$24 sps:$4 sm:$0xff]  }
 0x125   : > { %2722 = vmatprep.subr.bf16.mxu0 %v4971_v45  ;;  %2893 = vmatpush1.bf16.msra.mxu1 %v4966_v46  ;;  %v5047_v45 = vld [vmem:[#allocation5 + $0x9f0] ss:$24 sps:$4 sm:$0xff]  }
 0x126   : > { %2894 = vmatprep.subr.bf16.mxu1 %v4974_v47  ;;  %v5050_v46 = vld [vmem:[#allocation5 + $0x9f8] ss:$24 sps:$4 sm:$0xff]   ;;  %v5055_v47 = vld [vmem:[#allocation5 + $0xa24] ss:$24 sps:$4 sm:$0xff]  }
 0x128   : > { %2723 = vmatpush1.bf16.msra.mxu0 %v4969_v48  ;;  %v5058_v48 = vld [vmem:[#allocation5 + $0xa2c] ss:$24 sps:$4 sm:$0xff]  }
 0x129   : > { %2724 = vmatprep.subr.bf16.mxu0 %v4977_v50  ;;  %2895 = vmatpush1.bf16.msra.mxu1 %v4972_v51  ;;  %v5053_v50 = vld [vmem:[#allocation5 + $0xa20] ss:$24 sps:$4 sm:$0xff]  }
 0x12a   : > { %2896 = vmatprep.subr.bf16.mxu1 %v4980_v52  ;;  %v5056_v51 = vld [vmem:[#allocation5 + $0xa28] ss:$24 sps:$4 sm:$0xff]   ;;  %v5061_v52 = vld [vmem:[#allocation5 + $0xa54] ss:$24 sps:$4 sm:$0xff]  }
 0x12c   : > { %2725 = vmatpush1.bf16.msra.mxu0 %v4975_v53  ;;  %v5064_v53 = vld [vmem:[#allocation5 + $0xa5c] ss:$24 sps:$4 sm:$0xff]  }
 0x12d   : > { %2726 = vmatprep.subr.bf16.mxu0 %v4983_v54  ;;  %2897 = vmatpush1.bf16.msra.mxu1 %v4978_v55  ;;  %v5059_v54 = vld [vmem:[#allocation5 + $0xa50] ss:$24 sps:$4 sm:$0xff]  }
 0x12e   : > { %2898 = vmatprep.subr.bf16.mxu1 %v4986_v56  ;;  %v5062_v55 = vld [vmem:[#allocation5 + $0xa58] ss:$24 sps:$4 sm:$0xff]   ;;  %v5067_v56 = vld [vmem:[#allocation5 + $0xa84] ss:$24 sps:$4 sm:$0xff]  }
 0x130   : > { %2727 = vmatpush1.bf16.msra.mxu0 %v4981_v57  ;;  %v5070_v57 = vld [vmem:[#allocation5 + $0xa8c] ss:$24 sps:$4 sm:$0xff]  }
 0x131   : > { %2728 = vmatprep.subr.bf16.mxu0 %v4989_v58  ;;  %2899 = vmatpush1.bf16.msra.mxu1 %v4984_v59  ;;  %v5065_v58 = vld [vmem:[#allocation5 + $0xa80] ss:$24 sps:$4 sm:$0xff]  }
 0x132   : > { %2900 = vmatprep.subr.bf16.mxu1 %v4992_v60  ;;  %v5068_v59 = vld [vmem:[#allocation5 + $0xa88] ss:$24 sps:$4 sm:$0xff]   ;;  %v5073_v60 = vld [vmem:[#allocation5 + $0xab4] ss:$24 sps:$4 sm:$0xff]  }
 0x134   : > { %2729 = vmatpush1.bf16.msra.mxu0 %v4987_v61  ;;  %v5076_v61 = vld [vmem:[#allocation5 + $0xabc] ss:$24 sps:$4 sm:$0xff]  }
 0x135   : > { %2730 = vmatprep.subr.bf16.mxu0 %v4995_v62  ;;  %2901 = vmatpush1.bf16.msra.mxu1 %v4990_v63  ;;  %v5071_v62 = vld [vmem:[#allocation5 + $0xab0] ss:$24 sps:$4 sm:$0xff]  }
 0x136   : > { %2902 = vmatprep.subr.bf16.mxu1 %v4998_v0  ;;  %v5074_v63 = vld [vmem:[#allocation5 + $0xab8] ss:$24 sps:$4 sm:$0xff]   ;;  %v5079_v0 = vld [vmem:[#allocation5 + $0xae4] ss:$24 sps:$4 sm:$0xff]  }
 0x138   : > { %2731 = vmatpush1.bf16.msra.mxu0 %v4993_v1  ;;  %v5082_v1 = vld [vmem:[#allocation5 + $0xaec] ss:$24 sps:$4 sm:$0xff]  }
 0x139   : > { %2732 = vmatprep.subr.bf16.mxu0 %v5001_v2  ;;  %2903 = vmatpush1.bf16.msra.mxu1 %v4996_v3  ;;  %v5077_v2 = vld [vmem:[#allocation5 + $0xae0] ss:$24 sps:$4 sm:$0xff]  }
 0x13a   : > { %2904 = vmatprep.subr.bf16.mxu1 %v5004_v5  ;;  %v5080_v3 = vld [vmem:[#allocation5 + $0xae8] ss:$24 sps:$4 sm:$0xff]   ;;  %v5085_v5 = vld [vmem:[#allocation5 + $0xb14] ss:$24 sps:$4 sm:$0xff]  }
 0x13c   : > { %2733 = vmatpush1.bf16.msra.mxu0 %v4999_v6  ;;  %v5088_v6 = vld [vmem:[#allocation5 + $0xb1c] ss:$24 sps:$4 sm:$0xff]  }
 0x13d   : > { %2734 = vmatprep.subr.bf16.mxu0 %v5007_v7  ;;  %2905 = vmatpush1.bf16.msra.mxu1 %v5002_v8  ;;  %v5083_v7 = vld [vmem:[#allocation5 + $0xb10] ss:$24 sps:$4 sm:$0xff]  }
 0x13e   : > { %2906 = vmatprep.subr.bf16.mxu1 %v5010_v9  ;;  %v5086_v8 = vld [vmem:[#allocation5 + $0xb18] ss:$24 sps:$4 sm:$0xff]   ;;  %v5091_v9 = vld [vmem:[#allocation5 + $0xb44] ss:$24 sps:$4 sm:$0xff]  }
 0x140   : > { %2735 = vmatpush1.bf16.msra.mxu0 %v5005_v11  ;;  %v5094_v11 = vld [vmem:[#allocation5 + $0xb4c] ss:$24 sps:$4 sm:$0xff]  }
 0x141   : > { %2736 = vmatprep.subr.bf16.mxu0 %v5013_v12  ;;  %2907 = vmatpush1.bf16.msra.mxu1 %v5008_v13  ;;  %v5089_v12 = vld [vmem:[#allocation5 + $0xb40] ss:$24 sps:$4 sm:$0xff]  }
 0x142   : > { %2908 = vmatprep.subr.bf16.mxu1 %v5016_v17  ;;  %v5092_v13 = vld [vmem:[#allocation5 + $0xb48] ss:$24 sps:$4 sm:$0xff]   ;;  %v5100_v17 = vld [vmem:[#allocation5 + $0xb7c] ss:$24 sps:$4 sm:$0xff]  }
 0x144   : > { %2737 = vmatpush1.bf16.msra.mxu0 %v5011_v14  ;;  %v5097_v14 = vld [vmem:[#allocation5 + $0xb74] ss:$24 sps:$4 sm:$0xff]  }
 0x145   : > { %2749 = vmatprep.subr.bf16.mxu0 %v5019_v19  ;;  %2909 = vmatpush1.bf16.msra.mxu1 %v5014_v22  ;;  %v5095_v19 = vld [vmem:[#allocation5 + $0xb70] ss:$24 sps:$4 sm:$0xff]  }
 0x146   : > { %2921 = vmatprep.subr.bf16.mxu1 %v5022_v24  ;;  %v5098_v22 = vld [vmem:[#allocation5 + $0xb78] ss:$24 sps:$4 sm:$0xff]   ;;  %v5103_v24 = vld [vmem:[#allocation5 + $0xba4] ss:$24 sps:$4 sm:$0xff]  }
 0x147   : > { %2739 = vmatmul.mubr.bf16.vlgmr.msra.gmra.mrb[0].mxu0 %v5948_v23 }
 0x148   : > { %2750 = vmatpush1.bf16.msra.mxu0 %v5017_v25  ;;  %2781 = vmatprep.mubr.bf16.mxu0 %v5952_v26  ;;  %v5106_v25 = vld [vmem:[#allocation5 + $0xbac] ss:$24 sps:$4 sm:$0xff]  }
 0x149   : > { %2751 = vmatprep.subr.bf16.mxu0 %v5025_v27  ;;  %2911 = vmatmul.mubr.bf16.vlgmr.msra.gmra.mrb[0].mxu1 %v5948_v23  ;;  %v5101_v27 = vld [vmem:[#allocation5 + $0xba0] ss:$24 sps:$4 sm:$0xff]  }
 0x14a   : > { %2922 = vmatpush1.bf16.msra.mxu1 %v5020_v28  ;;  %2953 = vmatprep.mubr.bf16.mxu1 %v5952_v26  ;;  %v5104_v28 = vld [vmem:[#allocation5 + $0xba8] ss:$24 sps:$4 sm:$0xff]  }
 0x14b   : > { %2923 = vmatprep.subr.bf16.mxu1 %v5028_v29  ;;  %v5109_v29 = vld [vmem:[#allocation5 + $0xbd4] ss:$24 sps:$4 sm:$0xff]  }
 0x14c   : > { %2752 = vmatpush1.bf16.msra.mxu0 %v5023_v30  ;;  %v5112_v30 = vld [vmem:[#allocation5 + $0xbdc] ss:$24 sps:$4 sm:$0xff]  }
 0x14d   : > { %2753 = vmatprep.subr.bf16.mxu0 %v5031_v15  ;;  %v5110_v15 = vld [vmem:[#allocation5 + $0xbd8] ss:$24 sps:$4 sm:$0xff]  }
 0x14e   : > { %2924 = vmatpush1.bf16.msra.mxu1 %v5026_v31  ;;  %v5107_v31 = vld [vmem:[#allocation5 + $0xbd0] ss:$24 sps:$4 sm:$0xff]  }
 0x14f   : > { %2925 = vmatprep.subr.bf16.mxu1 %v5034_v32  ;;  %v5960_v32 = vcombine.low %v5941_v20, %v5944_v21  ;;  %v5124_v20 = vld [vmem:[#allocation5 + $0xa4] ss:$24 sps:$4 sm:$0xff]   ;;  %v5122_v21 = vld [vmem:[#allocation5 + $0xa0] ss:$24 sps:$4 sm:$0xff]  }
 0x150   : > { %2754 = vmatpush1.bf16.msra.mxu0 %v5029_v16  ;;  %v5115_v16 = vld [vmem:[#allocation5 + $0x14] ss:$24 sps:$4 sm:$0xff]  }
 0x151   : > { %2755 = vmatprep.subr.bf16.mxu0 %v5037_v35  ;;  %v5118_v35 = vld [vmem:[#allocation5 + $0x44] ss:$24 sps:$4 sm:$0xff]  }
 0x152   : > { %2926 = vmatpush1.bf16.msra.mxu1 %v5032_v34  ;;  %v5113_v34 = vld [vmem:[#allocation5 + $0x10] ss:$24 sps:$4 sm:$0xff]  }
 0x153   : > { %2927 = vmatprep.subr.bf16.mxu1 %v5040_v36  ;;  %v5116_v36 = vld [vmem:[#allocation5 + $0x40] ss:$24 sps:$4 sm:$0xff]  }
 0x154   : > { %2756 = vmatpush1.bf16.msra.mxu0 %v5035_v37  ;;  %v5121_v37 = vld [vmem:[#allocation5 + $0x74] ss:$24 sps:$4 sm:$0xff]  }
 0x155   : > { %2757 = vmatprep.subr.bf16.mxu0 %v5043_v39  ;;  %v5127_v39 = vld [vmem:[#allocation5 + $0xd4] ss:$24 sps:$4 sm:$0xff]  }
 0x156   : > { %2928 = vmatpush1.bf16.msra.mxu1 %v5038_v38  ;;  %v5119_v38 = vld [vmem:[#allocation5 + $0x70] ss:$24 sps:$4 sm:$0xff]  }
 0x157   : > { %2929 = vmatprep.subr.bf16.mxu1 %v5046_v40  ;;  %v5125_v40 = vld [vmem:[#allocation5 + $0xd0] ss:$24 sps:$4 sm:$0xff]  }
 0x158   : > { %2758 = vmatpush1.bf16.msra.mxu0 %v5041_v41  ;;  %v5130_v41 = vld [vmem:[#allocation5 + $0x104] ss:$24 sps:$4 sm:$0xff]  }
 0x159   : > { %2759 = vmatprep.subr.bf16.mxu0 %v5049_v43  ;;  %v5133_v43 = vld [vmem:[#allocation5 + $0x134] ss:$24 sps:$4 sm:$0xff]  }
 0x15a   : > { %2930 = vmatpush1.bf16.msra.mxu1 %v5044_v42  ;;  %v5128_v42 = vld [vmem:[#allocation5 + $0x100] ss:$24 sps:$4 sm:$0xff]  }
 0x15b   : > { %2931 = vmatprep.subr.bf16.mxu1 %v5052_v44  ;;  %v5136_v44 = vld [vmem:[#allocation5 + $0x164] ss:$24 sps:$4 sm:$0xff]  }
 0x15c   : > { %2760 = vmatpush1.bf16.msra.mxu0 %v5047_v45  ;;  %v5134_v45 = vld [vmem:[#allocation5 + $0x160] ss:$24 sps:$4 sm:$0xff]  }
 0x15d   : > { %2761 = vmatprep.subr.bf16.mxu0 %v5055_v47  ;;  %v5137_v47 = vld [vmem:[#allocation5 + $0x190] ss:$24 sps:$4 sm:$0xff]  }
 0x15e   : > { %2932 = vmatpush1.bf16.msra.mxu1 %v5050_v46  ;;  %v5139_v46 = vld [vmem:[#allocation5 + $0x194] ss:$24 sps:$4 sm:$0xff]  }
 0x15f   : > { %2933 = vmatprep.subr.bf16.mxu1 %v5058_v48  ;;  %v5142_v48 = vld [vmem:[#allocation5 + $0x1c4] ss:$24 sps:$4 sm:$0xff]  }
 0x160   : > { %2762 = vmatpush1.bf16.msra.mxu0 %v5053_v50  ;;  %v5140_v50 = vld [vmem:[#allocation5 + $0x1c0] ss:$24 sps:$4 sm:$0xff]  }
 0x161   : > { %2763 = vmatprep.subr.bf16.mxu0 %v5061_v52  ;;  %v5143_v52 = vld [vmem:[#allocation5 + $0x1f0] ss:$24 sps:$4 sm:$0xff]  }
 0x162   : > { %2934 = vmatpush1.bf16.msra.mxu1 %v5056_v51  ;;  %v5145_v51 = vld [vmem:[#allocation5 + $0x1f4] ss:$24 sps:$4 sm:$0xff]  }
 0x163   : > { %2935 = vmatprep.subr.bf16.mxu1 %v5064_v53  ;;  %v5148_v53 = vld [vmem:[#allocation5 + $0x224] ss:$24 sps:$4 sm:$0xff]  }
 0x164   : > { %2764 = vmatpush1.bf16.msra.mxu0 %v5059_v54  ;;  %v5146_v54 = vld [vmem:[#allocation5 + $0x220] ss:$24 sps:$4 sm:$0xff]  }
 0x165   : > { %2765 = vmatprep.subr.bf16.mxu0 %v5067_v56  ;;  %v5149_v56 = vld [vmem:[#allocation5 + $0x250] ss:$24 sps:$4 sm:$0xff]  }
 0x166   : > { %2936 = vmatpush1.bf16.msra.mxu1 %v5062_v55  ;;  %v5151_v55 = vld [vmem:[#allocation5 + $0x254] ss:$24 sps:$4 sm:$0xff]  }
 0x167   : > { %2937 = vmatprep.subr.bf16.mxu1 %v5070_v57  ;;  %v5154_v57 = vld [vmem:[#allocation5 + $0x284] ss:$24 sps:$4 sm:$0xff]  }
 0x168   : > { %2766 = vmatpush1.bf16.msra.mxu0 %v5065_v58  ;;  %v5152_v58 = vld [vmem:[#allocation5 + $0x280] ss:$24 sps:$4 sm:$0xff]  }
 0x169   : > { %2767 = vmatprep.subr.bf16.mxu0 %v5073_v60  ;;  %v5155_v60 = vld [vmem:[#allocation5 + $0x2b0] ss:$24 sps:$4 sm:$0xff]  }
 0x16a   : > { %2938 = vmatpush1.bf16.msra.mxu1 %v5068_v59  ;;  %v5157_v59 = vld [vmem:[#allocation5 + $0x2b4] ss:$24 sps:$4 sm:$0xff]  }
 0x16b   : > { %2939 = vmatprep.subr.bf16.mxu1 %v5076_v61  ;;  %v5160_v61 = vld [vmem:[#allocation5 + $0x2e4] ss:$24 sps:$4 sm:$0xff]  }
 0x16c   : > { %2768 = vmatpush1.bf16.msra.mxu0 %v5071_v62  ;;  %v5158_v62 = vld [vmem:[#allocation5 + $0x2e0] ss:$24 sps:$4 sm:$0xff]  }
 0x16d   : > { %2769 = vmatprep.subr.bf16.mxu0 %v5079_v0  ;;  %v5161_v0 = vld [vmem:[#allocation5 + $0x310] ss:$24 sps:$4 sm:$0xff]  }
 0x16e   : > { %2940 = vmatpush1.bf16.msra.mxu1 %v5074_v63  ;;  %v5163_v63 = vld [vmem:[#allocation5 + $0x314] ss:$24 sps:$4 sm:$0xff]  }
 0x16f   : > { %2941 = vmatprep.subr.bf16.mxu1 %v5082_v1  ;;  %v5166_v1 = vld [vmem:[#allocation5 + $0x344] ss:$24 sps:$4 sm:$0xff]  }
 0x170   : > { %2770 = vmatpush1.bf16.msra.mxu0 %v5077_v2  ;;  %v5164_v2 = vld [vmem:[#allocation5 + $0x340] ss:$24 sps:$4 sm:$0xff]  }
 0x171   : > { %2771 = vmatprep.subr.bf16.mxu0 %v5085_v5  ;;  %v5167_v5 = vld [vmem:[#allocation5 + $0x370] ss:$24 sps:$4 sm:$0xff]  }
 0x172   : > { %2942 = vmatpush1.bf16.msra.mxu1 %v5080_v3  ;;  %v5169_v3 = vld [vmem:[#allocation5 + $0x374] ss:$24 sps:$4 sm:$0xff]  }
 0x173   : > { %2943 = vmatprep.subr.bf16.mxu1 %v5088_v6  ;;  %v5172_v6 = vld [vmem:[#allocation5 + $0x3a4] ss:$24 sps:$4 sm:$0xff]  }
 0x174   : > { %2772 = vmatpush1.bf16.msra.mxu0 %v5083_v7  ;;  %v5170_v7 = vld [vmem:[#allocation5 + $0x3a0] ss:$24 sps:$4 sm:$0xff]  }
 0x175   : > { %2773 = vmatprep.subr.bf16.mxu0 %v5091_v9  ;;  %v5173_v9 = vld [vmem:[#allocation5 + $0x3d0] ss:$24 sps:$4 sm:$0xff]  }
 0x176   : > { %2944 = vmatpush1.bf16.msra.mxu1 %v5086_v8  ;;  %v5175_v8 = vld [vmem:[#allocation5 + $0x3d4] ss:$24 sps:$4 sm:$0xff]  }
 0x177   : > { %2945 = vmatprep.subr.bf16.mxu1 %v5094_v11  ;;  %v5178_v11 = vld [vmem:[#allocation5 + $0x404] ss:$24 sps:$4 sm:$0xff]  }
 0x178   : > { %2774 = vmatpush1.bf16.msra.mxu0 %v5089_v12  ;;  %v5181_v12 = vld [vmem:[#allocation5 + $0x434] ss:$24 sps:$4 sm:$0xff]  }
 0x179   : > { %2775 = vmatprep.subr.bf16.mxu0 %v5097_v14  ;;  %v5182_v14 = vld [vmem:[#allocation5 + $0x460] ss:$24 sps:$4 sm:$0xff]  }
 0x17a   : > { %2946 = vmatpush1.bf16.msra.mxu1 %v5092_v13  ;;  %v5184_v13 = vld [vmem:[#allocation5 + $0x464] ss:$24 sps:$4 sm:$0xff]  }
 0x17b   : > { %2947 = vmatprep.subr.bf16.mxu1 %v5100_v17  ;;  %v5187_v17 = vld [vmem:[#allocation5 + $0x494] ss:$24 sps:$4 sm:$0xff]  }
 0x17c   : > { %2776 = vmatpush1.bf16.msra.mxu0 %v5095_v19  ;;  %v5185_v19 = vld [vmem:[#allocation5 + $0x490] ss:$24 sps:$4 sm:$0xff]  }
 0x17d   : > { %2777 = vmatprep.subr.bf16.mxu0 %v5103_v24  ;;  %v5188_v24 = vld [vmem:[#allocation5 + $0x4c0] ss:$24 sps:$4 sm:$0xff]  }
 0x17e   : > { %2948 = vmatpush1.bf16.msra.mxu1 %v5098_v22  ;;  %v5190_v22 = vld [vmem:[#allocation5 + $0x4c4] ss:$24 sps:$4 sm:$0xff]  }
 0x17f   : > { %2949 = vmatprep.subr.bf16.mxu1 %v5106_v25  ;;  %v5193_v25 = vld [vmem:[#allocation5 + $0x4f4] ss:$24 sps:$4 sm:$0xff]  }
 0x180   : > { %2778 = vmatpush1.bf16.msra.mxu0 %v5101_v27  ;;  %v5191_v27 = vld [vmem:[#allocation5 + $0x4f0] ss:$24 sps:$4 sm:$0xff]  }
 0x181   : > { %2779 = vmatprep.subr.bf16.mxu0 %v5109_v29  ;;  %v5194_v29 = vld [vmem:[#allocation5 + $0x520] ss:$24 sps:$4 sm:$0xff]  }
 0x182   : > { %2950 = vmatpush1.bf16.msra.mxu1 %v5104_v28  ;;  %v5196_v28 = vld [vmem:[#allocation5 + $0x524] ss:$24 sps:$4 sm:$0xff]  }
 0x183   : > { %2951 = vmatprep.subr.bf16.mxu1 %v5112_v30  ;;  %v5199_v30 = vld [vmem:[#allocation5 + $0x554] ss:$24 sps:$4 sm:$0xff]  }
 0x184   : > { %2780 = vmatpush1.bf16.msra.mxu0 %v5107_v31  ;;  %v5197_v31 = vld [vmem:[#allocation5 + $0x550] ss:$24 sps:$4 sm:$0xff]  }
 0x185   : > { %2964 = vmatprep.subr.bf16.mxu0 %v5115_v16  ;;  %v5200_v16 = vld [vmem:[#allocation5 + $0x580] ss:$24 sps:$4 sm:$0xff]  }
 0x186   : > { %2952 = vmatpush1.bf16.msra.mxu1 %v5110_v15  ;;  %v5202_v15 = vld [vmem:[#allocation5 + $0x584] ss:$24 sps:$4 sm:$0xff]  }
 0x187   : > { %2782 = vmatmul.mubr.bf16.vlgmr.msra.gmra.mrb[0].mxu0 %v5960_v32 }
 0x188   : > { %2965 = vmatpush1.bf16.msra.mxu0 %v5113_v34  ;;  %2996 = vmatprep.mubr.bf16.mxu0 %v5902_v49  ;;  %v5131_v49 = vld [vmem:[#allocation5 + $0x130] ss:$24 sps:$4 sm:$0xff]   ;;  %v5205_v34 = vld [vmem:[#allocation5 + $0x5b4] ss:$24 sps:$4 sm:$0xff]  }
 0x189   : > { %2954 = vmatmul.mubr.bf16.vlgmr.msra.gmra.mrb[0].mxu1 %v5960_v32  ;;  %2966 = vmatprep.subr.bf16.mxu0 %v5118_v35  ;;  %v5203_v35 = vld [vmem:[#allocation5 + $0x5b0] ss:$24 sps:$4 sm:$0xff]  }
 0x18c   : > { %2967 = vmatpush1.bf16.msra.mxu0 %v5116_v36  ;;  %v5208_v36 = vld [vmem:[#allocation5 + $0x5e4] ss:$24 sps:$4 sm:$0xff]  }
 0x18d   : > { %2968 = vmatprep.subr.bf16.mxu0 %v5121_v37  ;;  %v5206_v37 = vld [vmem:[#allocation5 + $0x5e0] ss:$24 sps:$4 sm:$0xff]  }
 0x190   : > { %2969 = vmatpush1.bf16.msra.mxu0 %v5119_v38  ;;  %v5211_v38 = vld [vmem:[#allocation5 + $0x614] ss:$24 sps:$4 sm:$0xff]  }
 0x191   : > { %2970 = vmatprep.subr.bf16.mxu0 %v5124_v20  ;;  %v5209_v20 = vld [vmem:[#allocation5 + $0x610] ss:$24 sps:$4 sm:$0xff]  }
 0x194   : > { %2971 = vmatpush1.bf16.msra.mxu0 %v5122_v21  ;;  %v5214_v21 = vld [vmem:[#allocation5 + $0x644] ss:$24 sps:$4 sm:$0xff]  }
 0x195   : > { %2972 = vmatprep.subr.bf16.mxu0 %v5127_v39  ;;  %v5305_v39 = vld [vmem:[#allocation8] ss:$24 sps:$4 sm:$0xff]  }
 0x198   : > { %2973 = vmatpush1.bf16.msra.mxu0 %v5125_v40  ;;  %v5307_v40 = vld [vmem:[#allocation8 + $0x4] ss:$24 sps:$4 sm:$0xff]  }
 0x199   : > { %2974 = vmatprep.subr.bf16.mxu0 %v5130_v41  ;;  %v5212_v41 = vld [vmem:[#allocation5 + $0x640] ss:$24 sps:$4 sm:$0xff]   ;;  %3800 = vmatprep.subr.bf16.mxu1 %v5307_v40 }
 0x19a   : > { %3801 = vmatpush1.bf16.msra.mxu1 %v5305_v39 }
 0x19c   : > { %2975 = vmatpush1.bf16.msra.mxu0 %v5128_v42  ;;  %v5310_v42 = vld [vmem:[#allocation8 + $0x34] ss:$24 sps:$4 sm:$0xff]  }
 0x19d   : > { %2976 = vmatprep.subr.bf16.mxu0 %v5133_v43  ;;  %v5217_v43 = vld [vmem:[#allocation5 + $0x674] ss:$24 sps:$4 sm:$0xff]   ;;  %3802 = vmatprep.subr.bf16.mxu1 %v5310_v42 }
 0x1a0   : > { %2977 = vmatpush1.bf16.msra.mxu0 %v5131_v49  ;;  %v5308_v49 = vld [vmem:[#allocation8 + $0x30] ss:$24 sps:$4 sm:$0xff]  }
 0x1a1   : > { %2978 = vmatprep.subr.bf16.mxu0 %v5136_v44  ;;  %v5313_v44 = vld [vmem:[#allocation8 + $0x64] ss:$24 sps:$4 sm:$0xff]   ;;  %3803 = vmatpush1.bf16.msra.mxu1 %v5308_v49 }
 0x1a2   : > { %3804 = vmatprep.subr.bf16.mxu1 %v5313_v44 }
 0x1a4   : > { %2979 = vmatpush1.bf16.msra.mxu0 %v5134_v45  ;;  %v5215_v45 = vld [vmem:[#allocation5 + $0x670] ss:$24 sps:$4 sm:$0xff]  }
 0x1a5   : > { %2980 = vmatprep.subr.bf16.mxu0 %v5139_v46  ;;  %v5220_v46 = vld [vmem:[#allocation5 + $0x6a4] ss:$24 sps:$4 sm:$0xff]  }
 0x1a8   : > { %2981 = vmatpush1.bf16.msra.mxu0 %v5137_v47  ;;  %v5316_v47 = vld [vmem:[#allocation8 + $0x94] ss:$24 sps:$4 sm:$0xff]  }
 0x1a9   : > { %2982 = vmatprep.subr.bf16.mxu0 %v5142_v48  ;;  %v5218_v48 = vld [vmem:[#allocation5 + $0x6a0] ss:$24 sps:$4 sm:$0xff]  }
 0x1ac   : > { %2983 = vmatpush1.bf16.msra.mxu0 %v5140_v50  ;;  %v5314_v50 = vld [vmem:[#allocation8 + $0x90] ss:$24 sps:$4 sm:$0xff]  }
 0x1ad   : > { %2984 = vmatprep.subr.bf16.mxu0 %v5145_v51  ;;  %v5319_v51 = vld [vmem:[#allocation8 + $0xc4] ss:$24 sps:$4 sm:$0xff]  }
 0x1b0   : > { %2985 = vmatpush1.bf16.msra.mxu0 %v5143_v52  ;;  %v5221_v52 = vld [vmem:[#allocation5 + $0x6d0] ss:$24 sps:$4 sm:$0xff]  }
 0x1b1   : > { %2986 = vmatprep.subr.bf16.mxu0 %v5148_v53  ;;  %v5226_v53 = vld [vmem:[#allocation5 + $0x704] ss:$24 sps:$4 sm:$0xff]  }
 0x1b4   : > { %2987 = vmatpush1.bf16.msra.mxu0 %v5146_v54  ;;  %v5317_v54 = vld [vmem:[#allocation8 + $0xc0] ss:$24 sps:$4 sm:$0xff]  }
 0x1b5   : > { %2988 = vmatprep.subr.bf16.mxu0 %v5151_v55  ;;  %v5322_v55 = vld [vmem:[#allocation8 + $0xf4] ss:$24 sps:$4 sm:$0xff]  }
 0x1b8   : > { %2989 = vmatpush1.bf16.msra.mxu0 %v5149_v56  ;;  %v5224_v56 = vld [vmem:[#allocation5 + $0x700] ss:$24 sps:$4 sm:$0xff]  }
 0x1b9   : > { %2990 = vmatprep.subr.bf16.mxu0 %v5154_v57  ;;  %v5229_v57 = vld [vmem:[#allocation5 + $0x734] ss:$24 sps:$4 sm:$0xff]  }
 0x1bc   : > { %2991 = vmatpush1.bf16.msra.mxu0 %v5152_v58  ;;  %v5320_v58 = vld [vmem:[#allocation8 + $0xf0] ss:$24 sps:$4 sm:$0xff]  }
 0x1bd   : > { %2992 = vmatprep.subr.bf16.mxu0 %v5157_v59  ;;  %v5227_v59 = vld [vmem:[#allocation5 + $0x730] ss:$24 sps:$4 sm:$0xff]  }
 0x1c0   : > { %2993 = vmatpush1.bf16.msra.mxu0 %v5155_v60  ;;  %v5232_v60 = vld [vmem:[#allocation5 + $0x764] ss:$24 sps:$4 sm:$0xff]  }
 0x1c1   : > { %2994 = vmatprep.subr.bf16.mxu0 %v5160_v61  ;;  %v5230_v61 = vld [vmem:[#allocation5 + $0x760] ss:$24 sps:$4 sm:$0xff]  }
 0x1c4   : > { %2995 = vmatpush1.bf16.msra.mxu0 %v5158_v62  ;;  %v5235_v62 = vld [vmem:[#allocation5 + $0x794] ss:$24 sps:$4 sm:$0xff]  }
 0x1c5   : > { %3007 = vmatprep.subr.bf16.mxu0 %v5163_v63  ;;  %v5233_v63 = vld [vmem:[#allocation5 + $0x790] ss:$24 sps:$4 sm:$0xff]  }
 0x1c7   : > { %2997 = vmatmul.mubr.bf16.vlgmr.msra.gmra.mrb[4].mxu0 %v5906_v4  ;;  %v5176_v4 = vld [vmem:[#allocation5 + $0x400] ss:$24 sps:$4 sm:$0xff]  }
 0x1c8   : > { %3008 = vmatpush1.bf16.msra.mxu0 %v5161_v0  ;;  %3039 = vmatprep.mubr.bf16.mxu0 %v5918_v33  ;;  %v5179_v33 = vld [vmem:[#allocation5 + $0x430] ss:$24 sps:$4 sm:$0xff]   ;;  %v5238_v0 = vld [vmem:[#allocation5 + $0x7c4] ss:$24 sps:$4 sm:$0xff]  }
 0x1c9   : > { %3009 = vmatprep.subr.bf16.mxu0 %v5166_v1  ;;  %v5236_v1 = vld [vmem:[#allocation5 + $0x7c0] ss:$24 sps:$4 sm:$0xff]  }
 0x1cc   : > { %3010 = vmatpush1.bf16.msra.mxu0 %v5164_v2  ;;  %v5241_v2 = vld [vmem:[#allocation5 + $0x7f4] ss:$24 sps:$4 sm:$0xff]  }
 0x1cd   : > { %3011 = vmatprep.subr.bf16.mxu0 %v5169_v3  ;;  %v5239_v3 = vld [vmem:[#allocation5 + $0x7f0] ss:$24 sps:$4 sm:$0xff]  }
 0x1d0   : > { %3012 = vmatpush1.bf16.msra.mxu0 %v5167_v5  ;;  %v5244_v5 = vld [vmem:[#allocation5 + $0x824] ss:$24 sps:$4 sm:$0xff]  }
 0x1d1   : > { %3013 = vmatprep.subr.bf16.mxu0 %v5172_v6  ;;  %v5242_v6 = vld [vmem:[#allocation5 + $0x820] ss:$24 sps:$4 sm:$0xff]  }
 0x1d4   : > { %3014 = vmatpush1.bf16.msra.mxu0 %v5170_v7  ;;  %v5247_v7 = vld [vmem:[#allocation5 + $0x854] ss:$24 sps:$4 sm:$0xff]  }
 0x1d5   : > { %3015 = vmatprep.subr.bf16.mxu0 %v5175_v8  ;;  %v5245_v8 = vld [vmem:[#allocation5 + $0x850] ss:$24 sps:$4 sm:$0xff]  }
 0x1d8   : > { %3016 = vmatpush1.bf16.msra.mxu0 %v5173_v9  ;;  %v5250_v9 = vld [vmem:[#allocation5 + $0x884] ss:$24 sps:$4 sm:$0xff]  }
 0x1d9   : > { %3017 = vmatprep.subr.bf16.mxu0 %v5178_v11  ;;  %v5248_v11 = vld [vmem:[#allocation5 + $0x880] ss:$24 sps:$4 sm:$0xff]  }
 0x1dc   : > { %3018 = vmatpush1.bf16.msra.mxu0 %v5176_v4  ;;  %v5253_v4 = vld [vmem:[#allocation5 + $0x8b4] ss:$24 sps:$4 sm:$0xff]  }
 0x1dd   : > { %3019 = vmatprep.subr.bf16.mxu0 %v5181_v12  ;;  %v5251_v12 = vld [vmem:[#allocation5 + $0x8b0] ss:$24 sps:$4 sm:$0xff]  }
 0x1e0   : > { %3020 = vmatpush1.bf16.msra.mxu0 %v5179_v33  ;;  %v5256_v33 = vld [vmem:[#allocation5 + $0x8e4] ss:$24 sps:$4 sm:$0xff]  }
 0x1e1   : > { %3021 = vmatprep.subr.bf16.mxu0 %v5184_v13  ;;  %v5254_v13 = vld [vmem:[#allocation5 + $0x8e0] ss:$24 sps:$4 sm:$0xff]  }
 0x1e4   : > { %3022 = vmatpush1.bf16.msra.mxu0 %v5182_v14  ;;  %v5259_v14 = vld [vmem:[#allocation5 + $0x914] ss:$24 sps:$4 sm:$0xff]  }
 0x1e5   : > { %3023 = vmatprep.subr.bf16.mxu0 %v5187_v17  ;;  %v5257_v17 = vld [vmem:[#allocation5 + $0x910] ss:$24 sps:$4 sm:$0xff]  }
 0x1e8   : > { %3024 = vmatpush1.bf16.msra.mxu0 %v5185_v19  ;;  %v5262_v19 = vld [vmem:[#allocation5 + $0x944] ss:$24 sps:$4 sm:$0xff]  }
 0x1e9   : > { %3025 = vmatprep.subr.bf16.mxu0 %v5190_v22  ;;  %v5260_v22 = vld [vmem:[#allocation5 + $0x940] ss:$24 sps:$4 sm:$0xff]  }
 0x1ec   : > { %3026 = vmatpush1.bf16.msra.mxu0 %v5188_v24  ;;  %v5265_v24 = vld [vmem:[#allocation5 + $0x974] ss:$24 sps:$4 sm:$0xff]  }
 0x1ed   : > { %3027 = vmatprep.subr.bf16.mxu0 %v5193_v25  ;;  %v5263_v25 = vld [vmem:[#allocation5 + $0x970] ss:$24 sps:$4 sm:$0xff]  }
 0x1f0   : > { %3028 = vmatpush1.bf16.msra.mxu0 %v5191_v27  ;;  %v5268_v27 = vld [vmem:[#allocation5 + $0x9a4] ss:$24 sps:$4 sm:$0xff]  }
 0x1f1   : > { %3029 = vmatprep.subr.bf16.mxu0 %v5196_v28  ;;  %v5266_v28 = vld [vmem:[#allocation5 + $0x9a0] ss:$24 sps:$4 sm:$0xff]  }
 0x1f4   : > { %3030 = vmatpush1.bf16.msra.mxu0 %v5194_v29  ;;  %v5271_v29 = vld [vmem:[#allocation5 + $0x9d4] ss:$24 sps:$4 sm:$0xff]  }
 0x1f5   : > { %3031 = vmatprep.subr.bf16.mxu0 %v5199_v30  ;;  %v5269_v30 = vld [vmem:[#allocation5 + $0x9d0] ss:$24 sps:$4 sm:$0xff]  }
 0x1f8   : > { %3032 = vmatpush1.bf16.msra.mxu0 %v5197_v31  ;;  %v269_v31 = vlaneseq }
 0x1f9   : > { %3033 = vmatprep.subr.bf16.mxu0 %v5202_v15  ;;  %v5274_v15 = vld [vmem:[#allocation5 + $0xa04] ss:$24 sps:$4 sm:$0xff]  }
 0x1fc   : > { %3034 = vmatpush1.bf16.msra.mxu0 %v5200_v16  ;;  %v5971_v16 = vshrl.u32 %v269_v31, 7  ;;  %v5352_v31 = vld [vmem:[#allocation8 + $0x2d4] ss:$24 sps:$4 sm:$0xff]  }
 0x1fd   : > { %3035 = vmatprep.subr.bf16.mxu0 %v5205_v34 }
 0x1fe   : > { %vm272_vm0 = vcmp.eq.s32.totalorder %v5971_v16, 0  ;;  %vm3140_vm1 = vcmp.lt.s32.totalorder %v5971_v16, 1  ;;  %vm3149_vm2 = vcmp.lt.s32.totalorder %v5971_v16, 7 }
 0x200   : > { %3036 = vmatpush1.bf16.msra.mxu0 %v5203_v35 }
 0x201   : > { %3037 = vmatprep.subr.bf16.mxu0 %v5208_v36 }
 0x204   : > { %3038 = vmatpush1.bf16.msra.mxu0 %v5206_v37 }
 0x205   : > { %3050 = vmatprep.subr.bf16.mxu0 %v5211_v38  ;;  %v5275_v38 = vld [vmem:[#allocation5 + $0xa30] ss:$24 sps:$4 sm:$0xff]  }
 0x207   : > { %3040 = vmatmul.mubr.bf16.vlgmr.msra.gmra.mrb[4].mxu0 %v5924_v10  ;;  %v5311_v10 = vld [vmem:[#allocation8 + $0x60] ss:$24 sps:$4 sm:$0xff]  }
 0x208   : > { %3051 = vmatpush1.bf16.msra.mxu0 %v5209_v20  ;;  %3082 = vmatprep.mubr.bf16.mxu0 %v5935_v18  ;;  %v5223_v18 = vld [vmem:[#allocation5 + $0x6d4] ss:$24 sps:$4 sm:$0xff]  }
 0x209   : > { %3052 = vmatprep.subr.bf16.mxu0 %v5214_v21  ;;  %3805 = vmatpush1.bf16.msra.mxu1 %v5311_v10 }
 0x20a   : > { %3806 = vmatprep.subr.bf16.mxu1 %v5316_v47 }
 0x20c   : > { %3053 = vmatpush1.bf16.msra.mxu0 %v5212_v41  ;;  %v5280_v41 = vld [vmem:[#allocation5 + $0xa64] ss:$24 sps:$4 sm:$0xff]  }
 0x20d   : > { %3054 = vmatprep.subr.bf16.mxu0 %v5217_v43  ;;  %3807 = vmatpush1.bf16.msra.mxu1 %v5314_v50  ;;  %v5278_v50 = vld [vmem:[#allocation5 + $0xa60] ss:$24 sps:$4 sm:$0xff]  }
 0x20e   : > { %3808 = vmatprep.subr.bf16.mxu1 %v5319_v51 }
 0x210   : > { %3055 = vmatpush1.bf16.msra.mxu0 %v5215_v45 }
 0x211   : > { %3056 = vmatprep.subr.bf16.mxu0 %v5220_v46  ;;  %3809 = vmatpush1.bf16.msra.mxu1 %v5317_v54  ;;  %v5283_v54 = vld [vmem:[#allocation5 + $0xa94] ss:$24 sps:$4 sm:$0xff]  }
 0x212   : > { %3810 = vmatprep.subr.bf16.mxu1 %v5322_v55 }
 0x214   : > { %3057 = vmatpush1.bf16.msra.mxu0 %v5218_v48 }
 0x215   : > { %3058 = vmatprep.subr.bf16.mxu0 %v5223_v18  ;;  %3811 = vmatpush1.bf16.msra.mxu1 %v5320_v58  ;;  %v5284_v58 = vld [vmem:[#allocation5 + $0xac0] ss:$24 sps:$4 sm:$0xff]  }
 0x218   : > { %3059 = vmatpush1.bf16.msra.mxu0 %v5221_v52 }
 0x219   : > { %3060 = vmatprep.subr.bf16.mxu0 %v5226_v53 }
 0x21c   : > { %3061 = vmatpush1.bf16.msra.mxu0 %v5224_v56  ;;  %v5281_v56 = vld [vmem:[#allocation5 + $0xa90] ss:$24 sps:$4 sm:$0xff]  }
 0x21d   : > { %3062 = vmatprep.subr.bf16.mxu0 %v5229_v57  ;;  %v5286_v57 = vld [vmem:[#allocation5 + $0xac4] ss:$24 sps:$4 sm:$0xff]  }
 0x220   : > { %3063 = vmatpush1.bf16.msra.mxu0 %v5227_v59  ;;  %v5289_v59 = vld [vmem:[#allocation5 + $0xaf4] ss:$24 sps:$4 sm:$0xff]  }
 0x221   : > { %3064 = vmatprep.subr.bf16.mxu0 %v5232_v60  ;;  %v5287_v60 = vld [vmem:[#allocation5 + $0xaf0] ss:$24 sps:$4 sm:$0xff]  }
 0x224   : > { %3065 = vmatpush1.bf16.msra.mxu0 %v5230_v61  ;;  %v5292_v61 = vld [vmem:[#allocation5 + $0xb24] ss:$24 sps:$4 sm:$0xff]  }
 0x225   : > { %3066 = vmatprep.subr.bf16.mxu0 %v5235_v62  ;;  %v5290_v62 = vld [vmem:[#allocation5 + $0xb20] ss:$24 sps:$4 sm:$0xff]  }
 0x228   : > { %3067 = vmatpush1.bf16.msra.mxu0 %v5233_v63  ;;  %v5295_v63 = vld [vmem:[#allocation5 + $0xb54] ss:$24 sps:$4 sm:$0xff]  }
 0x229   : > { %3068 = vmatprep.subr.bf16.mxu0 %v5238_v0  ;;  %v5293_v0 = vld [vmem:[#allocation5 + $0xb50] ss:$24 sps:$4 sm:$0xff]  }
 0x22c   : > { %3069 = vmatpush1.bf16.msra.mxu0 %v5236_v1  ;;  %v5298_v1 = vld [vmem:[#allocation5 + $0xb84] ss:$24 sps:$4 sm:$0xff]  }
 0x22d   : > { %3070 = vmatprep.subr.bf16.mxu0 %v5241_v2  ;;  %v5296_v2 = vld [vmem:[#allocation5 + $0xb80] ss:$24 sps:$4 sm:$0xff]  }
 0x230   : > { %3071 = vmatpush1.bf16.msra.mxu0 %v5239_v3  ;;  %v5301_v3 = vld [vmem:[#allocation5 + $0xbb4] ss:$24 sps:$4 sm:$0xff]  }
 0x231   : > { %3072 = vmatprep.subr.bf16.mxu0 %v5244_v5  ;;  %v5299_v5 = vld [vmem:[#allocation5 + $0xbb0] ss:$24 sps:$4 sm:$0xff]  }
 0x234   : > { %3073 = vmatpush1.bf16.msra.mxu0 %v5242_v6  ;;  %v5304_v6 = vld [vmem:[#allocation5 + $0xbe4] ss:$24 sps:$4 sm:$0xff]  }
 0x235   : > { %3074 = vmatprep.subr.bf16.mxu0 %v5247_v7  ;;  %v5302_v7 = vld [vmem:[#allocation5 + $0xbe0] ss:$24 sps:$4 sm:$0xff]  }
 0x238   : > { %3075 = vmatpush1.bf16.msra.mxu0 %v5245_v8  ;;  %v5325_v8 = vld [vmem:[#allocation8 + $0x124] ss:$24 sps:$4 sm:$0xff]  }
 0x239   : > { %3076 = vmatprep.subr.bf16.mxu0 %v5250_v9  ;;  %v5323_v9 = vld [vmem:[#allocation8 + $0x120] ss:$24 sps:$4 sm:$0xff]   ;;  %3812 = vmatprep.subr.bf16.mxu1 %v5325_v8 }
 0x23a   : > { %3813 = vmatpush1.bf16.msra.mxu1 %v5323_v9 }
 0x23c   : > { %3077 = vmatpush1.bf16.msra.mxu0 %v5248_v11  ;;  %v5328_v11 = vld [vmem:[#allocation8 + $0x154] ss:$24 sps:$4 sm:$0xff]  }
 0x23d   : > { %3078 = vmatprep.subr.bf16.mxu0 %v5253_v4  ;;  %v5326_v4 = vld [vmem:[#allocation8 + $0x150] ss:$24 sps:$4 sm:$0xff]   ;;  %3814 = vmatprep.subr.bf16.mxu1 %v5328_v11 }
 0x23e   : > { %3815 = vmatpush1.bf16.msra.mxu1 %v5326_v4 }
 0x240   : > { %3079 = vmatpush1.bf16.msra.mxu0 %v5251_v12  ;;  %v5331_v12 = vld [vmem:[#allocation8 + $0x184] ss:$24 sps:$4 sm:$0xff]  }
 0x241   : > { %3080 = vmatprep.subr.bf16.mxu0 %v5256_v33  ;;  %v5329_v33 = vld [vmem:[#allocation8 + $0x180] ss:$24 sps:$4 sm:$0xff]   ;;  %3816 = vmatprep.subr.bf16.mxu1 %v5331_v12 }
 0x242   : > { %3817 = vmatpush1.bf16.msra.mxu1 %v5329_v33 }
 0x244   : > { %3081 = vmatpush1.bf16.msra.mxu0 %v5254_v13  ;;  %v5334_v13 = vld [vmem:[#allocation8 + $0x1b4] ss:$24 sps:$4 sm:$0xff]  }
 0x245   : > { %3093 = vmatprep.subr.bf16.mxu0 %v5259_v14  ;;  %v5332_v14 = vld [vmem:[#allocation8 + $0x1b0] ss:$24 sps:$4 sm:$0xff]   ;;  %3818 = vmatprep.subr.bf16.mxu1 %v5334_v13 }
 0x246   : > { %3819 = vmatpush1.bf16.msra.mxu1 %v5332_v14 }
 0x247   : > { %3083 = vmatmul.mubr.bf16.vlgmr.msra.gmra.mrb[4].mxu0 %v5948_v23  ;;  %v5272_v23 = vld [vmem:[#allocation5 + $0xa00] ss:$24 sps:$4 sm:$0xff]  }
 0x248   : > { %3094 = vmatpush1.bf16.msra.mxu0 %v5257_v17  ;;  %3125 = vmatprep.mubr.bf16.mxu0 %v5952_v26  ;;  %v5277_v26 = vld [vmem:[#allocation5 + $0xa34] ss:$24 sps:$4 sm:$0xff]   ;;  %v5335_v17 = vld [vmem:[#allocation8 + $0x1e0] ss:$24 sps:$4 sm:$0xff]  }
 0x249   : > { %3095 = vmatprep.subr.bf16.mxu0 %v5262_v19  ;;  %v5337_v19 = vld [vmem:[#allocation8 + $0x1e4] ss:$24 sps:$4 sm:$0xff]  }
 0x24a   : > { %3820 = vmatprep.subr.bf16.mxu1 %v5337_v19 }
 0x24b   : > { %3821 = vmatpush1.bf16.msra.mxu1 %v5335_v17 }
 0x24c   : > { %3096 = vmatpush1.bf16.msra.mxu0 %v5260_v22  ;;  %v5340_v22 = vld [vmem:[#allocation8 + $0x214] ss:$24 sps:$4 sm:$0xff]  }
 0x24d   : > { %3097 = vmatprep.subr.bf16.mxu0 %v5265_v24  ;;  %3822 = vmatprep.subr.bf16.mxu1 %v5340_v22  ;;  %v5343_v24 = vld [vmem:[#allocation8 + $0x244] ss:$24 sps:$4 sm:$0xff]  }
 0x250   : > { %3098 = vmatpush1.bf16.msra.mxu0 %v5263_v25  ;;  %v5341_v25 = vld [vmem:[#allocation8 + $0x240] ss:$24 sps:$4 sm:$0xff]  }
 0x251   : > { %3099 = vmatprep.subr.bf16.mxu0 %v5268_v27  ;;  %v5346_v27 = vld [vmem:[#allocation8 + $0x274] ss:$24 sps:$4 sm:$0xff]  }
 0x254   : > { %3100 = vmatpush1.bf16.msra.mxu0 %v5266_v28  ;;  %v5344_v28 = vld [vmem:[#allocation8 + $0x270] ss:$24 sps:$4 sm:$0xff]  }
 0x255   : > { %3101 = vmatprep.subr.bf16.mxu0 %v5271_v29  ;;  %v5349_v29 = vld [vmem:[#allocation8 + $0x2a4] ss:$24 sps:$4 sm:$0xff]  }
 0x258   : > { %3102 = vmatpush1.bf16.msra.mxu0 %v5269_v30  ;;  %v5347_v30 = vld [vmem:[#allocation8 + $0x2a0] ss:$24 sps:$4 sm:$0xff]  }
 0x259   : > { %3103 = vmatprep.subr.bf16.mxu0 %v5274_v15  ;;  %v5350_v15 = vld [vmem:[#allocation8 + $0x2d0] ss:$24 sps:$4 sm:$0xff]  }
 0x25a   : > { %v2783_v34 = vpop.f32.mrb[0].mxu0 }
 0x25b   : > { %v2785_v35 = vpop.f32.mrb[1].mxu0  ;;  %v3136_v20 = vrot.slane %v2783_v34, 7 }
 0x25c   : > { %v2787_v36 = vpop.f32.mrb[2].mxu0  ;;  %3104 = vmatpush1.bf16.msra.mxu0 %v5272_v23  ;;  %v2955_v37 = vpop.f32.mrb[0].mxu1  ;;  %v3137_v42 = vrot.slane %v2785_v35, 7  ;;  %v5355_v23 = vld [vmem:[#allocation8 + $0xc] ss:$24 sps:$4 sm:$0xff]   ;;  %v3174_v35 = vsub.s32 0, %v5971_v16 }
 0x25d   : > { %v3138_v21 = vrot.slane %v2787_v36, 7  ;;  %v2789_v39 = vpop.f32.mrb[3].mxu0  ;;  %v2957_v40 = vpop.f32.mrb[1].mxu1  ;;  %3105 = vmatprep.subr.bf16.mxu0 %v5277_v26  ;;  %v5997_v26 = vadd.s32 8, %v5971_v16 }
 0x25e   : > { %v3139_v43 = vrot.slane %v2789_v39, 7  ;;  %v2959_v49 = vpop.f32.mrb[2].mxu1 }
 0x25f   : > { %v3143_v44 = vsel %vm3140_vm1, %v3138_v21, %v3136_v20  ;;  %v3141_v45 = vsel %vm3140_vm1, %v3136_v20, %v3138_v21  ;;  %v2961_v46 = vpop.f32.mrb[3].mxu1  ;;  %vm275_vm3 = vcmp.eq.s32.totalorder %v5997_v26, 15 }
 0x260   : > { %v3154_v10 = vsel %vm272_vm0, 0.0, %v3143_v44  ;;  %v3144_v47 = vsel %vm3140_vm1, %v3139_v43, %v3137_v42  ;;  %v5983_v48 = vadd.f32 %v3141_v45, %v2959_v49  ;;  %v3142_v18 = vsel %vm3140_vm1, %v3137_v42, %v3139_v43  ;;  %3106 = vmatpush1.bf16.msra.mxu0 %v5275_v38 }
 0x261   : > { %v5987_v51 = vadd.f32 %v3154_v10, %v2955_v37  ;;  %v3155_v52 = vsel %vm272_vm0, 0.0, %v3144_v47  ;;  %v5991_v53 = vadd.f32 %v3142_v18, %v2961_v46  ;;  %3107 = vmatprep.subr.bf16.mxu0 %v5280_v41  ;;  %v3170_v37 = vld [vmem:[#allocation7] sm:$0x3]  ;;  %v3178_v38 = vsub.s32 1, %v5971_v16 }
 0x262   : > { %v5993_v55 = vadd.f32 %v3155_v52, %v2957_v40  ;;  %v3175_v42 = vrot.slane %v3170_v37, %v3174_v35 }
 0x263   : > { %v3179_v45 = vrot.slane %v3170_v37, %v3178_v38  ;;  %v5358_v38 = vld [vmem:[#allocation8 + $0x3c] ss:$24 sps:$4 sm:$0xff]  }
 0x264   : > { %3108 = vmatpush1.bf16.msra.mxu0 %v5278_v50 }
 0x265   : > { %3109 = vmatprep.subr.bf16.mxu0 %v5283_v54 }
 0x268   : > { %3110 = vmatpush1.bf16.msra.mxu0 %v5281_v56 }
 0x269   : > { %3111 = vmatprep.subr.bf16.mxu0 %v5286_v57 }
 0x26c   : > { %3112 = vmatpush1.bf16.msra.mxu0 %v5284_v58 }
 0x26d   : > { %3113 = vmatprep.subr.bf16.mxu0 %v5289_v59 }
 0x270   : > { %3114 = vmatpush1.bf16.msra.mxu0 %v5287_v60 }
 0x271   : > { %3115 = vmatprep.subr.bf16.mxu0 %v5292_v61 }
 0x274   : > { %3116 = vmatpush1.bf16.msra.mxu0 %v5290_v62 }
 0x275   : > { %3117 = vmatprep.subr.bf16.mxu0 %v5295_v63 }
 0x278   : > { %3118 = vmatpush1.bf16.msra.mxu0 %v5293_v0 }
 0x279   : > { %3119 = vmatprep.subr.bf16.mxu0 %v5298_v1 }
 0x27c   : > { %3120 = vmatpush1.bf16.msra.mxu0 %v5296_v2 }
 0x27d   : > { %3121 = vmatprep.subr.bf16.mxu0 %v5301_v3 }
 0x280   : > { %3122 = vmatpush1.bf16.msra.mxu0 %v5299_v5 }
 0x281   : > { %3123 = vmatprep.subr.bf16.mxu0 %v5304_v6 }
 0x284   : > { %3124 = vmatpush1.bf16.msra.mxu0 %v5302_v7 }
 0x287   : > { %3126 = vmatmul.mubr.bf16.vlgmr.msra.gmra.mrb[4].mxu0 %v5960_v32  ;;  %v5338_v32 = vld [vmem:[#allocation8 + $0x210] ss:$24 sps:$4 sm:$0xff]  }
 0x288   : > { %3823 = vmatpush1.bf16.msra.mxu1 %v5338_v32 }
 0x289   : > { %3824 = vmatprep.subr.bf16.mxu1 %v5343_v24 }
 0x28c   : > { %3825 = vmatpush1.bf16.msra.mxu1 %v5341_v25 }
 0x28d   : > { %3826 = vmatprep.subr.bf16.mxu1 %v5346_v27 }
 0x290   : > { %3827 = vmatpush1.bf16.msra.mxu1 %v5344_v28 }
 0x291   : > { %3828 = vmatprep.subr.bf16.mxu1 %v5349_v29 }
 0x294   : > { %3829 = vmatpush1.bf16.msra.mxu1 %v5347_v30 }
 0x295   : > { %3830 = vmatprep.subr.bf16.mxu1 %v5352_v31 }
 0x298   : > { %3831 = vmatpush1.bf16.msra.mxu1 %v5350_v15 }
 0x299   : > { %3843 = vmatprep.subr.bf16.mxu1 %v5355_v23 }
 0x35a   : > { %v3127_v34 = vpop.f32.mrb[4].mxu0 }
 0x35b   : > { %v3129_v36 = vpop.f32.mrb[5].mxu0  ;;  %v3145_v21 = vrot.slane %v3127_v34, 1 }
 0x35c   : > { %v3131_v20 = vpop.f32.mrb[6].mxu0  ;;  %v3146_v41 = vrot.slane %v3129_v36, 1  ;;  %v5353_v36 = vld [vmem:[#allocation8 + $0x8] ss:$24 sps:$4 sm:$0xff]  }
 0x35d   : > { %v3147_v39 = vrot.slane %v3131_v20, 1  ;;  %v3133_v40 = vpop.f32.mrb[7].mxu0  ;;  %v5356_v20 = vld [vmem:[#allocation8 + $0x38] ss:$24 sps:$4 sm:$0xff]  }
 0x35e   : > { %v3148_v43 = vrot.slane %v3133_v40, 1  ;;  %v5364_v40 = vld [vmem:[#allocation8 + $0x9c] ss:$24 sps:$4 sm:$0xff]  }
 0x35f   : > { %v3150_v49 = vsel %vm3149_vm2, %v3145_v21, %v3147_v39  ;;  %v3152_v44 = vsel %vm3149_vm2, %v3147_v39, %v3145_v21  ;;  %v5361_v21 = vld [vmem:[#allocation8 + $0x6c] ss:$24 sps:$4 sm:$0xff]   ;;  %v5359_v39 = vld [vmem:[#allocation8 + $0x68] ss:$24 sps:$4 sm:$0xff]  }
 0x360   : > { %v3160_v46 = vsel %vm275_vm3, 0.0, %v3152_v44  ;;  %v3166_v10 = vadd.f32 %v5987_v51, %v3150_v49  ;;  %v3151_v47 = vsel %vm3149_vm2, %v3146_v41, %v3148_v43  ;;  %v3153_v18 = vsel %vm3149_vm2, %v3148_v43, %v3146_v41  ;;  %v5362_v41 = vld [vmem:[#allocation8 + $0x98] ss:$24 sps:$4 sm:$0xff]   ;;  %v5365_v43 = vld [vmem:[#allocation8 + $0xc8] ss:$24 sps:$4 sm:$0xff]  }
 0x361   : > { %v3168_v50 = vadd.f32 %v5983_v48, %v3160_v46  ;;  %v3161_v52 = vsel %vm275_vm3, 0.0, %v3153_v18  ;;  %v3167_v54 = vadd.f32 %v5993_v55, %v3151_v47  ;;  %v5370_v49 = vld [vmem:[#allocation8 + $0xfc] ss:$24 sps:$4 sm:$0xff]   ;;  %v5368_v44 = vld [vmem:[#allocation8 + $0xf8] ss:$24 sps:$4 sm:$0xff]  }
 0x362   : > { %v3182_v56 = vadd.f32 %v3175_v42, %v3166_v10  ;;  %v3169_v57 = vadd.f32 %v5991_v53, %v3161_v52  ;;  %v5371_v46 = vld [vmem:[#allocation8 + $0x128] ss:$24 sps:$4 sm:$0xff]   ;;  %v5376_v10 = vld [vmem:[#allocation8 + $0x15c] ss:$24 sps:$4 sm:$0xff]   ;;  %v5374_v47 = vld [vmem:[#allocation8 + $0x158] ss:$24 sps:$4 sm:$0xff]  }
 0x363   : > { %v3184_v58 = vadd.f32 %v3175_v42, %v3168_v50  ;;  %v3183_v59 = vadd.f32 %v3179_v45, %v3167_v54  ;;  %v5367_v42 = vld [vmem:[#allocation8 + $0xcc] ss:$24 sps:$4 sm:$0xff]   ;;  %v5377_v50 = vld [vmem:[#allocation8 + $0x188] ss:$24 sps:$4 sm:$0xff]   ;;  %v5382_v52 = vld [vmem:[#allocation8 + $0x1bc] ss:$24 sps:$4 sm:$0xff]  }
 0x364   : > { %v3186_v60 = vmul.f32 %v3182_v56, %v3182_v56  ;;  %v3185_v51 = vadd.f32 %v3179_v45, %v3169_v57  ;;  %v5373_v45 = vld [vmem:[#allocation8 + $0x12c] ss:$24 sps:$4 sm:$0xff]   ;;  %v5380_v54 = vld [vmem:[#allocation8 + $0x1b8] ss:$24 sps:$4 sm:$0xff]   ;;  %v5383_v57 = vld [vmem:[#allocation8 + $0x1e8] ss:$24 sps:$4 sm:$0xff]  }
 0x365   : > { %v3188_v61 = vmul.f32 %v3184_v58, %v3184_v58  ;;  %v3187_v62 = vmul.f32 %v3183_v59, %v3183_v59  ;;  %v5379_v18 = vld [vmem:[#allocation8 + $0x18c] ss:$24 sps:$4 sm:$0xff]  }
 0x366   : > { %v3190_v63 = vmul.f32 %v3186_v60, %v3182_v56  ;;  %v3189_v0 = vmul.f32 %v3185_v51, %v3185_v51  ;;  %v5391_v60 = vld [vmem:[#allocation8 + $0x24c] ss:$24 sps:$4 sm:$0xff]  }
 0x367   : > { %v3192_v1 = vmul.f32 %v3188_v61, %v3184_v58  ;;  %v3191_v2 = vmul.f32 %v3187_v62, %v3183_v59  ;;  %v5394_v61 = vld [vmem:[#allocation8 + $0x27c] ss:$24 sps:$4 sm:$0xff]   ;;  %v5392_v62 = vld [vmem:[#allocation8 + $0x278] ss:$24 sps:$4 sm:$0xff]  }
 0x368   : > { %v3194_v3 = vmul.f32 0.044715, %v3190_v63  ;;  %v3193_v48 = vmul.f32 %v3189_v0, %v3185_v51  ;;  %v5397_v63 = vld [vmem:[#allocation8 + $0x2ac] ss:$24 sps:$4 sm:$0xff]   ;;  %v5395_v0 = vld [vmem:[#allocation8 + $0x2a8] ss:$24 sps:$4 sm:$0xff]  }
 0x369   : > { %v3196_v5 = vmul.f32 0.044715, %v3192_v1  ;;  %v3195_v6 = vmul.f32 0.044715, %v3191_v2  ;;  %v5400_v1 = vld [vmem:[#allocation8 + $0x2dc] ss:$24 sps:$4 sm:$0xff]  }
 0x36a   : > { %v3197_v7 = vmul.f32 0.044715, %v3193_v48  ;;  %v3198_v8 = vadd.f32 %v3194_v3, %v3182_v56  ;;  %v5398_v2 = vld [vmem:[#allocation8 + $0x2d8] ss:$24 sps:$4 sm:$0xff]   ;;  %v5403_v3 = vld [vmem:[#allocation8 + $0x14] ss:$24 sps:$4 sm:$0xff]  }
 0x36b   : > { %v3199_v55 = vadd.f32 %v3195_v6, %v3183_v59  ;;  %v3200_v9 = vadd.f32 %v3196_v5, %v3184_v58  ;;  %v5401_v48 = vld [vmem:[#allocation8 + $0x10] ss:$24 sps:$4 sm:$0xff]   ;;  %v5406_v5 = vld [vmem:[#allocation8 + $0x44] ss:$24 sps:$4 sm:$0xff]   ;;  %v5404_v6 = vld [vmem:[#allocation8 + $0x40] ss:$24 sps:$4 sm:$0xff]  }
 0x36c   : > { %v3201_v11 = vadd.f32 %v3197_v7, %v3185_v51  ;;  %v3202_v53 = vmul.f32 0.7978846, %v3198_v8  ;;  %v5409_v7 = vld [vmem:[#allocation8 + $0x74] ss:$24 sps:$4 sm:$0xff]   ;;  %v5407_v8 = vld [vmem:[#allocation8 + $0x70] ss:$24 sps:$4 sm:$0xff]  }
 0x36d   : > { %v3203_v4 = vmul.f32 0.7978846, %v3199_v55  ;;  %v3204_v12 = vmul.f32 0.7978846, %v3200_v9  ;;  %v5412_v55 = vld [vmem:[#allocation8 + $0xa4] ss:$24 sps:$4 sm:$0xff]  }
 0x36e   : > { %v3205_v33 = vmul.f32 0.7978846, %v3201_v11  ;;  %5449 = vtanh.f32 %v3202_v53  ;;  %v5410_v9 = vld [vmem:[#allocation8 + $0xa0] ss:$24 sps:$4 sm:$0xff]   ;;  %v5415_v11 = vld [vmem:[#allocation8 + $0xd4] ss:$24 sps:$4 sm:$0xff]  }
 0x36f   : > { %5451 = vtanh.f32 %v3203_v4  ;;  %v5413_v53 = vld [vmem:[#allocation8 + $0xd0] ss:$24 sps:$4 sm:$0xff]   ;;  %v5418_v4 = vld [vmem:[#allocation8 + $0x104] ss:$24 sps:$4 sm:$0xff]  }
 0x370   : > { %5453 = vtanh.f32 %v3205_v33  ;;  %v5421_v33 = vld [vmem:[#allocation8 + $0x134] ss:$24 sps:$4 sm:$0xff]  }
 0x371   : > { %5455 = vtanh.f32 %v3204_v12  ;;  %v5416_v12 = vld [vmem:[#allocation8 + $0x100] ss:$24 sps:$4 sm:$0xff]  }
 0x378   : > { %v5450_v13 = vpop.eup %5449 }
 0x379   : > { %v5452_v14 = vpop.eup %5451  ;;  %v3210_v17 = vadd.f32 1.0, %v5450_v13  ;;  %v5419_v13 = vld [vmem:[#allocation8 + $0x130] ss:$24 sps:$4 sm:$0xff]  }
 0x37a   : > { %v5454_v19 = vpop.eup %5453  ;;  %v3211_v22 = vadd.f32 1.0, %v5452_v14  ;;  %v5424_v14 = vld [vmem:[#allocation8 + $0x164] ss:$24 sps:$4 sm:$0xff]  }
 0x37b   : > { %v5456_v32 = vpop.eup %5455  ;;  %v3213_v24 = vadd.f32 1.0, %v5454_v19  ;;  %v3214_v25 = vmul.f32 0.5, %v3210_v17  ;;  %v5422_v17 = vld [vmem:[#allocation8 + $0x160] ss:$24 sps:$4 sm:$0xff]   ;;  %v5427_v19 = vld [vmem:[#allocation8 + $0x194] ss:$24 sps:$4 sm:$0xff]  }
 0x37c   : > { %v3215_v27 = vmul.f32 0.5, %v3211_v22  ;;  %v3212_v28 = vadd.f32 1.0, %v5456_v32  ;;  %v5425_v22 = vld [vmem:[#allocation8 + $0x190] ss:$24 sps:$4 sm:$0xff]   ;;  %v5430_v32 = vld [vmem:[#allocation8 + $0x1c4] ss:$24 sps:$4 sm:$0xff]  }
 0x37d   : > { %v3217_v29 = vmul.f32 0.5, %v3213_v24  ;;  %v3218_v15 = vmul.f32 %v3214_v25, %v3182_v56  ;;  %v5385_v56 = vld [vmem:[#allocation8 + $0x1ec] ss:$24 sps:$4 sm:$0xff]   ;;  %v5428_v24 = vld [vmem:[#allocation8 + $0x1c0] ss:$24 sps:$4 sm:$0xff]  }
 0x37e   : > { %v3219_v30 = vmul.f32 %v3215_v27, %v3183_v59  ;;  %v3216_v31 = vmul.f32 0.5, %v3212_v28  ;;  %v5386_v59 = vld [vmem:[#allocation8 + $0x218] ss:$24 sps:$4 sm:$0xff]   ;;  %v5433_v25 = vld [vmem:[#allocation8 + $0x1f4] ss:$24 sps:$4 sm:$0xff]  }
 0x37f   : > { %v3221_v23 = vmul.f32 %v3217_v29, %v3185_v51  ;;  %v5389_v51 = vld [vmem:[#allocation8 + $0x248] ss:$24 sps:$4 sm:$0xff]   ;;  %v5436_v28 = vld [vmem:[#allocation8 + $0x224] ss:$24 sps:$4 sm:$0xff]  }
 0x380   : > { %v3220_v34 = vmul.f32 %v3216_v31, %v3184_v58  ;;  %v5388_v58 = vld [vmem:[#allocation8 + $0x21c] ss:$24 sps:$4 sm:$0xff]   ;;  %v5431_v27 = vld [vmem:[#allocation8 + $0x1f0] ss:$24 sps:$4 sm:$0xff]   ;;  %v5434_v29 = vld [vmem:[#allocation8 + $0x220] ss:$24 sps:$4 sm:$0xff]  }
 0x381   : > { %v6019_v35 = vpack.c.bf16 %v3221_v23, %v3219_v30  ;;  %v5439_v30 = vld [vmem:[#allocation8 + $0x254] ss:$24 sps:$4 sm:$0xff]   ;;  %v5437_v31 = vld [vmem:[#allocation8 + $0x250] ss:$24 sps:$4 sm:$0xff]   ;;  %v5440_v23 = vld [vmem:[#allocation8 + $0x280] ss:$24 sps:$4 sm:$0xff]  }
 0x382   : > { %v6021_v37 = vpack.c.bf16 %v3220_v34, %v3218_v15  ;;  %v5442_v15 = vld [vmem:[#allocation8 + $0x284] ss:$24 sps:$4 sm:$0xff]   ;;  %v5445_v34 = vld [vmem:[#allocation8 + $0x2b4] ss:$24 sps:$4 sm:$0xff]  }
 0x383   : > { %3832 = vmatprep.mubr.bf16.mxu1 %v6019_v35 }
 0x384   : > { %3833 = vmatmul.mubr.bf16.vlgmr.msra.gmra.mrb[4].mxu1 %v6021_v37 }
 0x385   : > { %3844 = vmatpush1.bf16.msra.mxu1 %v5353_v36  ;;  %3875 = vmatprep.mubr.bf16.mxu1 %v6019_v35  ;;  %v5448_v36 = vld [vmem:[#allocation8 + $0x2e4] ss:$24 sps:$4 sm:$0xff]  }
 0x386   : > { %3845 = vmatprep.subr.bf16.mxu1 %v5358_v38  ;;  %v5446_v38 = vld [vmem:[#allocation8 + $0x2e0] ss:$24 sps:$4 sm:$0xff]  }
 0x389   : > { %3846 = vmatpush1.bf16.msra.mxu1 %v5356_v20 }
 0x38a   : > { %3847 = vmatprep.subr.bf16.mxu1 %v5361_v21 }
 0x38d   : > { %3848 = vmatpush1.bf16.msra.mxu1 %v5359_v39 }
 0x38e   : > { %3849 = vmatprep.subr.bf16.mxu1 %v5364_v40 }
 0x391   : > { %3850 = vmatpush1.bf16.msra.mxu1 %v5362_v41 }
 0x392   : > { %3851 = vmatprep.subr.bf16.mxu1 %v5367_v42 }
 0x395   : > { %3852 = vmatpush1.bf16.msra.mxu1 %v5365_v43 }
 0x396   : > { %3853 = vmatprep.subr.bf16.mxu1 %v5370_v49 }
 0x399   : > { %3854 = vmatpush1.bf16.msra.mxu1 %v5368_v44 }
 0x39a   : > { %3855 = vmatprep.subr.bf16.mxu1 %v5373_v45 }
 0x39d   : > { %3856 = vmatpush1.bf16.msra.mxu1 %v5371_v46 }
 0x39e   : > { %3857 = vmatprep.subr.bf16.mxu1 %v5376_v10 }
 0x3a1   : > { %3858 = vmatpush1.bf16.msra.mxu1 %v5374_v47 }
 0x3a2   : > { %3859 = vmatprep.subr.bf16.mxu1 %v5379_v18 }
 0x3a5   : > { %3860 = vmatpush1.bf16.msra.mxu1 %v5377_v50 }
 0x3a6   : > { %3861 = vmatprep.subr.bf16.mxu1 %v5382_v52 }
 0x3a9   : > { %3862 = vmatpush1.bf16.msra.mxu1 %v5380_v54 }
 0x3aa   : > { %3863 = vmatprep.subr.bf16.mxu1 %v5385_v56 }
 0x3ad   : > { %3864 = vmatpush1.bf16.msra.mxu1 %v5383_v57 }
 0x3ae   : > { %3865 = vmatprep.subr.bf16.mxu1 %v5388_v58 }
 0x3b1   : > { %3866 = vmatpush1.bf16.msra.mxu1 %v5386_v59 }
 0x3b2   : > { %3867 = vmatprep.subr.bf16.mxu1 %v5391_v60 }
 0x3b5   : > { %3868 = vmatpush1.bf16.msra.mxu1 %v5389_v51 }
 0x3b6   : > { %3869 = vmatprep.subr.bf16.mxu1 %v5394_v61 }
 0x3b9   : > { %3870 = vmatpush1.bf16.msra.mxu1 %v5392_v62 }
 0x3ba   : > { %3871 = vmatprep.subr.bf16.mxu1 %v5397_v63 }
 0x3bd   : > { %3872 = vmatpush1.bf16.msra.mxu1 %v5395_v0 }
 0x3be   : > { %3873 = vmatprep.subr.bf16.mxu1 %v5400_v1 }
 0x3c1   : > { %3874 = vmatpush1.bf16.msra.mxu1 %v5398_v2 }
 0x3c2   : > { %3886 = vmatprep.subr.bf16.mxu1 %v5403_v3 }
 0x3c4   : > { %3876 = vmatmul.mubr.bf16.vlgmr.msra.gmra.mrb[8].mxu1 %v6021_v37 }
 0x3c5   : > { %3887 = vmatpush1.bf16.msra.mxu1 %v5401_v48  ;;  %3918 = vmatprep.mubr.bf16.mxu1 %v6019_v35  ;;  %v5443_v35 = vld [vmem:[#allocation8 + $0x2b0] ss:$24 sps:$4 sm:$0xff]  }
 0x3c6   : > { %3888 = vmatprep.subr.bf16.mxu1 %v5406_v5 }
 0x3c9   : > { %3889 = vmatpush1.bf16.msra.mxu1 %v5404_v6 }
 0x3ca   : > { %3890 = vmatprep.subr.bf16.mxu1 %v5409_v7 }
 0x3cd   : > { %3891 = vmatpush1.bf16.msra.mxu1 %v5407_v8 }
 0x3ce   : > { %3892 = vmatprep.subr.bf16.mxu1 %v5412_v55 }
 0x3d1   : > { %3893 = vmatpush1.bf16.msra.mxu1 %v5410_v9 }
 0x3d2   : > { %3894 = vmatprep.subr.bf16.mxu1 %v5415_v11 }
 0x3d5   : > { %3895 = vmatpush1.bf16.msra.mxu1 %v5413_v53 }
 0x3d6   : > { %3896 = vmatprep.subr.bf16.mxu1 %v5418_v4 }
 0x3d9   : > { %3897 = vmatpush1.bf16.msra.mxu1 %v5416_v12 }
 0x3da   : > { %3898 = vmatprep.subr.bf16.mxu1 %v5421_v33 }
 0x3dd   : > { %3899 = vmatpush1.bf16.msra.mxu1 %v5419_v13 }
 0x3de   : > { %3900 = vmatprep.subr.bf16.mxu1 %v5424_v14 }
 0x3e1   : > { %3901 = vmatpush1.bf16.msra.mxu1 %v5422_v17 }
 0x3e2   : > { %3902 = vmatprep.subr.bf16.mxu1 %v5427_v19 }
 0x3e5   : > { %3903 = vmatpush1.bf16.msra.mxu1 %v5425_v22 }
 0x3e6   : > { %3904 = vmatprep.subr.bf16.mxu1 %v5430_v32 }
 0x3e9   : > { %3905 = vmatpush1.bf16.msra.mxu1 %v5428_v24 }
 0x3ea   : > { %3906 = vmatprep.subr.bf16.mxu1 %v5433_v25 }
 0x3ed   : > { %3907 = vmatpush1.bf16.msra.mxu1 %v5431_v27 }
 0x3ee   : > { %3908 = vmatprep.subr.bf16.mxu1 %v5436_v28 }
 0x3f1   : > { %3909 = vmatpush1.bf16.msra.mxu1 %v5434_v29 }
 0x3f2   : > { %3910 = vmatprep.subr.bf16.mxu1 %v5439_v30 }
 0x3f5   : > { %3911 = vmatpush1.bf16.msra.mxu1 %v5437_v31 }
 0x3f6   : > { %3912 = vmatprep.subr.bf16.mxu1 %v5442_v15 }
 0x3f9   : > { %3913 = vmatpush1.bf16.msra.mxu1 %v5440_v23 }
 0x3fa   : > { %3914 = vmatprep.subr.bf16.mxu1 %v5445_v34 }
 0x3fd   : > { %3915 = vmatpush1.bf16.msra.mxu1 %v5443_v35 }
 0x3fe   : > { %3916 = vmatprep.subr.bf16.mxu1 %v5448_v36 }
 0x401   : > { %3917 = vmatpush1.bf16.msra.mxu1 %v5446_v38 }
 0x404   : > { %3919 = vmatmul.mubr.bf16.vlgmr.msra.gmra.mrb[12].mxu1 %v6021_v37 }
 0x457   : > { %v3834_v20 = vpop.f32.mrb[4].mxu1 }
 0x458   : > { %v3836_v21 = vpop.f32.mrb[5].mxu1  ;;  %v3929_v40 = vrot.slane %v3834_v20, 7 }
 0x459   : > { %v3838_v39 = vpop.f32.mrb[6].mxu1  ;;  %v3930_v43 = vrot.slane %v3836_v21, 7 }
 0x45a   : > { %v3931_v41 = vrot.slane %v3838_v39, 7  ;;  %v3840_v42 = vpop.f32.mrb[7].mxu1 }
 0x45b   : > { %v3932_v49 = vrot.slane %v3840_v42, 7 }
 0x45c   : > { %v3935_v44 = vsel %vm3140_vm1, %v3931_v41, %v3929_v40  ;;  %v3933_v45 = vsel %vm3140_vm1, %v3929_v40, %v3931_v41 }
 0x45d   : > { %v3936_v46 = vsel %vm3140_vm1, %v3932_v49, %v3930_v43  ;;  %v3934_v37 = vsel %vm3140_vm1, %v3930_v43, %v3932_v49  ;;  %v3945_v47 = vsel %vm272_vm0, 0.0, %v3935_v44 }
 0x45e   : > { %v3946_v52 = vsel %vm272_vm0, 0.0, %v3936_v46 }
 0x497   : > { %v3877_v10 = vpop.f32.mrb[8].mxu1 }
 0x498   : > { %v3953_v18 = vadd.f32 %v3945_v47, %v3877_v10  ;;  %v3879_v50 = vpop.f32.mrb[9].mxu1 }
 0x499   : > { %v3954_v54 = vadd.f32 %v3946_v52, %v3879_v50  ;;  %v3881_v56 = vpop.f32.mrb[10].mxu1 }
 0x49a   : > { %v3955_v57 = vadd.f32 %v3933_v45, %v3881_v56  ;;  %v3883_v58 = vpop.f32.mrb[11].mxu1 }
 0x49b   : > { %v3956_v59 = vadd.f32 %v3934_v37, %v3883_v58 }
 0x4d7   : > { %v3920_v60 = vpop.f32.mrb[12].mxu1 }
 0x4d8   : > { %v3922_v51 = vpop.f32.mrb[13].mxu1  ;;  %v3937_v62 = vrot.slane %v3920_v60, 1 }
 0x4d9   : > { %v3924_v61 = vpop.f32.mrb[14].mxu1  ;;  %v3938_v1 = vrot.slane %v3922_v51, 1 }
 0x4da   : > { %v3939_v63 = vrot.slane %v3924_v61, 1  ;;  %v3926_v0 = vpop.f32.mrb[15].mxu1 }
 0x4db   : > { %v3940_v2 = vrot.slane %v3926_v0, 1 }
 0x4dc   : > { %v3941_v3 = vsel %vm3149_vm2, %v3937_v62, %v3939_v63  ;;  %v3943_v48 = vsel %vm3149_vm2, %v3939_v63, %v3937_v62 }
 0x4dd   : > { %v3951_v5 = vsel %vm275_vm3, 0.0, %v3943_v48  ;;  %v3957_v6 = vadd.f32 %v3953_v18, %v3941_v3  ;;  %v3942_v7 = vsel %vm3149_vm2, %v3938_v1, %v3940_v2  ;;  %v3944_v8 = vsel %vm3149_vm2, %v3940_v2, %v3938_v1 }
 0x4de   : > { %v3959_v55 = vadd.f32 %v3955_v57, %v3951_v5  ;;  %v3952_v9 = vsel %vm275_vm3, 0.0, %v3944_v8  ;;  %v3958_v11 = vadd.f32 %v3954_v54, %v3942_v7 }
 0x4df   : > { %v3960_v53 = vadd.f32 %v3956_v59, %v3952_v9 }
 0x4e0   : > { %v4606_v4 = vpack.c.bf16 %v3958_v11, %v3957_v6 }
 0x4e1   : > { %v4607_v16 = vpack.c.bf16 %v3960_v53, %v3959_v55 }
 0x4e2   : > { %3973 = vst [vmem:[%s258_s29] sm:$0xff] %v4606_v4 }
 0x4e3   : > { %3974 = vst [vmem:[%s258_s29 + $0x8] sm:$0xff] %v4607_v16 }
 0x4e4   : > { %5584 = shalt.err (!%p5581_p4)
}
 0x4e5   : > { %s5585_s5 = scalar_lea.hbm %s6058_s27, 256  ;;  %s5589_s26 = scalar_lea.hbm %s6108_s4, 512 }
 0x4e6   : > { %p5586_p9 = scmp.ne.s32.totalorder %s6058_s27, %s5585_s5  ;;  %p5590_p8 = scmp.lt.u32.totalorder %s6058_s27, %s6108_s4 }
 0x4e7   : > { %p5591_p13 = scmp.lt.u32.totalorder %s5589_s26, %s5585_s5  ;;  %p5593_p10 = scmp.lt.u32.totalorder %s5585_s5, %s6058_s27 }
 0x4e8   : > { %p5587_p0 = pnand %p5586_p9, %p5834_p5 }
 0x4e9   : > { %p5592_p6 = por %p5591_p13, %p5590_p8 }
 0x4ea   : > { %p5588_p11 = pneg %p5587_p0 }
 0x4eb   : > { %p5594_p3 = por %p5593_p10, %p5592_p6 }
 0x4ed   : > { %p5595_p7 = pnand %p5594_p3, %p5588_p11 }
 0x4ef   : > { %5598 = shalt.err (!%p5595_p7)
}
 0x4f0   : > { %s5656_s23 = smov 128   ;;  %s5657_s29 = smov 8  }
 0x4f1   : > { %4660 = dma.vmem_to_hbm [thread:$0]  (%p5834_p5), %s6060_s6, 256, %s6058_s27, %s3976_s19, %s5656_s23, %s5656_s23, %s5657_s29  }
 0x4f2 PF: > { %s4005_s7 = sand.u32 1, %s5633_s15   ;;  %p6126_p12 = scmp.ne.s32.totalorder %s6113_s22, 0 }
 0x4f3   : > { %p6127_p1 = scmp.ge.s32.totalorder %s5645_s18, 2  ;;  %s4006_s8 = scalar_lea.sflag [#allocation4], %s4005_s7 }
 0x4f5   : > { %p4677_p2 = pnand %p6127_p1, %p6126_p12 }
 0x4f7   : > { %5628 = dma.done.wait (!%p4677_p2), %s4006_s8, 256  }
 0x4f8   : > { %5630 = vsyncadd (!%p4677_p2), %s4006_s8, 4294967040  ;;  %p19_p4 = scmp.ge.s32.totalorder %s5820_s10, 4   ;;  %s6128_s15 = smov %s5637_s16 }
 0x4f9   : > { %s6129_s16 = smov %s5641_s17  ;;  %s6130_s17 = smov %s5830_s12 }
 0x4fa   : > { %s6131_s18 = smov %s5820_s10  ;;  %21 = sbr.rel (!%p19_p4) target bundleno = 7 (0x7), region = 93 }
 0x501   :  { %4011 = vsyncpa [#allocation3], 1 }
 0x502   :  { %4013 = vsyncpa [#allocation3 + $0x1], 1 }
 0x503   :  { %4014 = vsyncpa [#allocation6], 1 }
 0x504   :  { %4015 = vsyncpa [#allocation9], 1 }
 0x505   :  { %4016 = vsyncpa [#allocation4], 1 }
 0x506   :  { %4018 = vsyncpa [#allocation4 + $0x1], 1 }

</bundles_post_ra>
